<compile_context>
chip_gen: v6e
topology: v6e:2x2x1
jax: 0.10.0
libtpu: 0.0.40
codegen_flags: <defaults>
</compile_context>

<pallas_src>
import functools
import math

import jax
import jax.numpy as jnp
from jax import lax
from jax.experimental import pallas as pl
from jax.experimental.pallas import tpu as pltpu

MATMUL_DTYPE = jnp.bfloat16   # MXU operand dtype (accumulation stays f32)
LN_EPS = 1e-5                 # PyTorch nn.LayerNorm default


# ---------------------------------------------------------------------------
# shared math helpers (used by both the kernels and the pure-JAX reference)
# ---------------------------------------------------------------------------
def _layernorm(x, w, b, eps=LN_EPS):
    mu = jnp.mean(x, axis=-1, keepdims=True)
    var = jnp.mean(jnp.square(x - mu), axis=-1, keepdims=True)
    return (x - mu) * lax.rsqrt(var + eps) * w + b


def _gelu_tanh(x):
    c = math.sqrt(2.0 / math.pi)
    return 0.5 * x * (1.0 + jnp.tanh(c * (x + 0.044715 * x * x * x)))


def _mm(a, b):
    """Reference matmul mirroring the kernel policy: bf16 operands, f32 accum."""
    return jnp.dot(a.astype(MATMUL_DTYPE), b.astype(MATMUL_DTYPE),
                   preferred_element_type=jnp.float32)


# ---------------------------------------------------------------------------
# fused transformer-block kernel
# ---------------------------------------------------------------------------
def _block_kernel(x_ref, ln1w_ref, ln1b_ref, wq_ref, wk_ref, wv_ref,
                  wo_ref, bo_ref, ln2w_ref, ln2b_ref, w1_ref, b1_ref,
                  w2_ref, b2_ref, out_ref, *, n_heads):
    BB, N, C = x_ref.shape
    D = C // n_heads
    M = BB * N

    x = x_ref[...].reshape(M, C)                              # (M, C) f32

    # ---- LayerNorm 1 + fused QKV projections (batch folded into M) --------
    h = _layernorm(x, ln1w_ref[...], ln1b_ref[...])
    hb = h.astype(MATMUL_DTYPE)
    q = jnp.dot(hb, wq_ref[...], preferred_element_type=jnp.float32)  # scale pre-folded
    k = jnp.dot(hb, wk_ref[...], preferred_element_type=jnp.float32)
    v = jnp.dot(hb, wv_ref[...], preferred_element_type=jnp.float32)

    # causal mask (TransformerBlock: tril of ones), hoisted out of the head loop
    row = lax.broadcasted_iota(jnp.int32, (N, N), 0)
    col = lax.broadcasted_iota(jnp.int32, (N, N), 1)
    causal = row >= col                                       # (N, N) bool

    # ---- attention: batched over BB, static unroll over heads -------------
    # per-head output projection is accumulated (no concat, no transposes).
    attn_out = jnp.zeros((M, C), jnp.float32)
    for hd in range(n_heads):
        lo = hd * D
        qh = q[:, lo:lo + D].reshape(BB, N, D).astype(MATMUL_DTYPE)
        kh = k[:, lo:lo + D].reshape(BB, N, D).astype(MATMUL_DTYPE)
        vh = v[:, lo:lo + D].reshape(BB, N, D).astype(MATMUL_DTYPE)

        # scores without materializing k.T (contract last dims of both)
        s = jnp.einsum('bnd,bmd->bnm', qh, kh,
                       preferred_element_type=jnp.float32)    # (BB, N, N)
        s = jnp.where(causal, s, -1e30)

        mx = jnp.max(s, axis=-1, keepdims=True)
        e = jnp.exp(s - mx)
        w = e * pl.reciprocal(jnp.sum(e, axis=-1, keepdims=True), approx=True)

        ctx = jnp.einsum('bnm,bmd->bnd', w.astype(MATMUL_DTYPE), vh,
                         preferred_element_type=jnp.float32)  # (BB, N, D)

        attn_out = attn_out + jnp.dot(
            ctx.reshape(M, D).astype(MATMUL_DTYPE), wo_ref[hd],
            preferred_element_type=jnp.float32)               # (M, C)

    attn_out = attn_out + bo_ref[...]
    res1 = x + attn_out                                       # residual 1 (dropout = id)

    # ---- LayerNorm 2 + FFN -------------------------------------------------
    h2 = _layernorm(res1, ln2w_ref[...], ln2b_ref[...]).astype(MATMUL_DTYPE)
    ff = jnp.dot(h2, w1_ref[...], preferred_element_type=jnp.float32) + b1_ref[...]
    ff = _gelu_tanh(ff).astype(MATMUL_DTYPE)
    ff = jnp.dot(ff, w2_ref[...], preferred_element_type=jnp.float32) + b2_ref[...]

    out_ref[...] = (ff + res1).reshape(BB, N, C).astype(out_ref.dtype)


def transformer_block_forward(x, p, *, n_heads, batch_block=None):
    B, N, C = x.shape
    BB = B if batch_block is None else batch_block
    assert B % BB == 0
    H = n_heads
    D = C // H
    F = p['w1'].shape[1]

    kernel = functools.partial(_block_kernel, n_heads=n_heads)
    return pl.pallas_call(
        kernel,
        out_shape=jax.ShapeDtypeStruct((B, N, C), jnp.float32),
        grid_spec=pltpu.PrefetchScalarGridSpec(
            num_scalar_prefetch=0,
            grid=(B // BB,),
            in_specs=[
                pl.BlockSpec((BB, N, C), lambda i: (i, 0, 0)),   # x
                pl.BlockSpec((1, C), lambda i: (0, 0)),          # ln1 weight
                pl.BlockSpec((1, C), lambda i: (0, 0)),          # ln1 bias
                pl.BlockSpec((C, C), lambda i: (0, 0)),          # wq (scaled, bf16)
                pl.BlockSpec((C, C), lambda i: (0, 0)),          # wk
                pl.BlockSpec((C, C), lambda i: (0, 0)),          # wv
                pl.BlockSpec((H, D, C), lambda i: (0, 0, 0)),    # wo per head
                pl.BlockSpec((1, C), lambda i: (0, 0)),          # out-proj bias
                pl.BlockSpec((1, C), lambda i: (0, 0)),          # ln2 weight
                pl.BlockSpec((1, C), lambda i: (0, 0)),          # ln2 bias
                pl.BlockSpec((C, F), lambda i: (0, 0)),          # ffn w1
                pl.BlockSpec((1, F), lambda i: (0, 0)),          # ffn b1
                pl.BlockSpec((F, C), lambda i: (0, 0)),          # ffn w2
                pl.BlockSpec((1, C), lambda i: (0, 0)),          # ffn b2
            ],
            out_specs=pl.BlockSpec((BB, N, C), lambda i: (i, 0, 0)),
        ),
        compiler_params=pltpu.CompilerParams(
            dimension_semantics=("parallel",)),
    )(x, p['ln1_w'], p['ln1_b'], p['wq'], p['wk'], p['wv'], p['wo'], p['bo'],
      p['ln2_w'], p['ln2_b'], p['w1'], p['b1'], p['w2'], p['b2'])


# ---------------------------------------------------------------------------
# final LayerNorm + vocab projection (lane-dense output, last dim = vocab)
# ---------------------------------------------------------------------------
def _lm_head_kernel(x_ref, lnw_ref, lnb_ref, wv_ref, out_ref):
    BB, N, C = x_ref.shape
    V = wv_ref.shape[1]
    x = x_ref[...].reshape(BB * N, C)
    h = _layernorm(x, lnw_ref[...], lnb_ref[...]).astype(MATMUL_DTYPE)
    logits = jnp.dot(h, wv_ref[...], preferred_element_type=jnp.float32)
    out_ref[...] = logits.reshape(BB, N, V).astype(out_ref.dtype)


def lm_head_forward(x, ln_w, ln_b, w_vocab, *, batch_block=None):
    B, N, C = x.shape
    V = w_vocab.shape[1]
    BB = B if batch_block is None else batch_block
    assert B % BB == 0
    return pl.pallas_call(
        _lm_head_kernel,
        out_shape=jax.ShapeDtypeStruct((B, N, V), jnp.float32),
        grid_spec=pltpu.PrefetchScalarGridSpec(
            num_scalar_prefetch=0,
            grid=(B // BB,),
            in_specs=[
                pl.BlockSpec((BB, N, C), lambda i: (i, 0, 0)),
                pl.BlockSpec((1, C), lambda i: (0, 0)),
                pl.BlockSpec((1, C), lambda i: (0, 0)),
                pl.BlockSpec((C, V), lambda i: (0, 0)),
            ],
            out_specs=pl.BlockSpec((BB, N, V), lambda i: (i, 0, 0)),
        ),
        compiler_params=pltpu.CompilerParams(
            dimension_semantics=("parallel",)),
    )(x, ln_w, ln_b, w_vocab)


# ---------------------------------------------------------------------------
# one-time weight preparation (hoisted out of the per-call path)
# ---------------------------------------------------------------------------
def prepare_block_params(raw, *, n_heads):
    C = raw['ln1_w'].shape[0]
    H, D = n_heads, C // n_heads
    scale = D ** (-0.5)
    dt = MATMUL_DTYPE
    w_qkv = raw['w_qkv']                                   # (3C, C) PyTorch layout
    # qkv.reshape(B,N,C,3).permute(3,...) => q/k/v are stride-3 interleaved rows
    wq = jnp.transpose(w_qkv[0::3, :]) * scale             # (C, C); scale folded in
    wk = jnp.transpose(w_qkv[1::3, :])
    wv = jnp.transpose(w_qkv[2::3, :])
    wo = jnp.transpose(raw['w_out']).reshape(H, D, C)      # per-head slabs of W_out.T
    return dict(
        ln1_w=raw['ln1_w'].reshape(1, C), ln1_b=raw['ln1_b'].reshape(1, C),
        wq=wq.astype(dt), wk=wk.astype(dt), wv=wv.astype(dt),
        wo=wo.astype(dt), bo=raw['b_out'].reshape(1, C),
        ln2_w=raw['ln2_w'].reshape(1, C), ln2_b=raw['ln2_b'].reshape(1, C),
        w1=jnp.transpose(raw['w_ffn1']).astype(dt),
        b1=raw['b_ffn1'].reshape(1, -1),
        w2=jnp.transpose(raw['w_ffn2']).astype(dt),
        b2=raw['b_ffn2'].reshape(1, C),
    )


def prepare_gpt_params(raw, *, n_heads):
    C = raw['out_norm_w'].shape[0]
    return dict(
        tok_emb=raw['tok_emb'],
        pos_emb=raw['pos_emb'],
        out_norm_w=raw['out_norm_w'].reshape(1, C),
        out_norm_b=raw['out_norm_b'].reshape(1, C),
        w_vocab=jnp.transpose(raw['w_vocab']).astype(MATMUL_DTYPE),   # (C, V)
        blocks=[prepare_block_params(bp, n_heads=n_heads) for bp in raw['blocks']],
    )


def gpt_forward(token_ids, params, *, n_heads, batch_block=None):
    B, N = token_ids.shape
    # TODO(synk): embedding row gathers left to XLA (jnp.take); a per-token
    # Pallas Element-gather grid would be pure per-step overhead at this size.
    x = jnp.take(params['tok_emb'], token_ids, axis=0) + params['pos_emb'][:N][None, :, :]
    # dropout(drop_rate=0.0) == identity
    for bp in params['blocks']:
        x = transformer_block_forward(x, bp, n_heads=n_heads, batch_block=batch_block)
    return lm_head_forward(x, params['out_norm_w'], params['out_norm_b'],
                           params['w_vocab'], batch_block=batch_block)


# ---------------------------------------------------------------------------
# pure-JAX reference mirroring the PyTorch forward (same bf16-operand policy)
# ---------------------------------------------------------------------------
def _ref_mhsa(x, bp, mask, n_heads):
    B, N, C = x.shape
    D = C // n_heads
    scale = D ** (-0.5)
    qkv = _mm(x, bp['w_qkv'].T).reshape(B, N, C, 3)
    q, k, v = jnp.moveaxis(qkv, -1, 0)
    def heads(t):
        return t.reshape(B, N, n_heads, D).transpose(0, 2, 1, 3)
    q, k, v = heads(q), heads(k), heads(v)
    s = scale * jnp.einsum('bhnd,bhmd->bhnm', q.astype(MATMUL_DTYPE),
                           k.astype(MATMUL_DTYPE),
                           preferred_element_type=jnp.float32)
    s = jnp.where(mask, s, -jnp.inf)
    w = jax.nn.softmax(s, axis=-1)
    ctx = jnp.einsum('bhnm,bhmd->bhnd', w.astype(MATMUL_DTYPE),
                     v.astype(MATMUL_DTYPE),
                     preferred_element_type=jnp.float32)
    ctx = ctx.transpose(0, 2, 1, 3).reshape(B, N, C)
    return _mm(ctx, bp['w_out'].T) + bp['b_out']


def gpt_reference(token_ids, raw, *, n_heads):
    B, N = token_ids.shape
    x = jnp.take(raw['tok_emb'], token_ids, axis=0) + raw['pos_emb'][:N][None, :, :]
    mask = jnp.tril(jnp.ones((N, N), dtype=bool))
    for bp in raw['blocks']:
        h = _layernorm(x, bp['ln1_w'], bp['ln1_b'])
        x = _ref_mhsa(h, bp, mask, n_heads) + x
        h = _layernorm(x, bp['ln2_w'], bp['ln2_b'])
        ff = _gelu_tanh(_mm(h, bp['w_ffn1'].T) + bp['b_ffn1'])
        x = _mm(ff, bp['w_ffn2'].T) + bp['b_ffn2'] + x
    h = _layernorm(x, raw['out_norm_w'], raw['out_norm_b'])
    return _mm(h, raw['w_vocab'].T)


# ---------------------------------------------------------------------------
# demo / self-test
# ---------------------------------------------------------------------------
def init_raw_params(key, cfg):
    C, V, L, F = cfg['embed_dim'], cfg['vocab_size'], cfg['ctx_len'], 4 * cfg['embed_dim']
    ks = jax.random.split(key, 6 + cfg['n_layers'])
    raw = dict(
        tok_emb=jax.random.normal(ks[0], (V, C), jnp.float32) * 0.5,
        pos_emb=jax.random.normal(ks[1], (L, C), jnp.float32) * 0.5,
        out_norm_w=1.0 + 0.1 * jax.random.normal(ks[2], (C,), jnp.float32),
        out_norm_b=0.02 * jax.random.normal(ks[3], (C,), jnp.float32),
        w_vocab=jax.random.normal(ks[4], (V, C), jnp.float32) * C ** -0.5,
        blocks=[],
    )
    for i in range(cfg['n_layers']):
        kb = jax.random.split(ks[6 + i], 10)
        raw['blocks'].append(dict(
            ln1_w=1.0 + 0.1 * jax.random.normal(kb[0], (C,), jnp.float32),
            ln1_b=0.02 * jax.random.normal(kb[1], (C,), jnp.float32),
            w_qkv=jax.random.normal(kb[2], (3 * C, C), jnp.float32) * C ** -0.5,
            w_out=jax.random.normal(kb[3], (C, C), jnp.float32) * C ** -0.5,
            b_out=0.02 * jax.random.normal(kb[4], (C,), jnp.float32),
            ln2_w=1.0 + 0.1 * jax.random.normal(kb[5], (C,), jnp.float32),
            ln2_b=0.02 * jax.random.normal(kb[6], (C,), jnp.float32),
            w_ffn1=jax.random.normal(kb[7], (F, C), jnp.float32) * C ** -0.5,
            b_ffn1=0.02 * jax.random.normal(kb[8], (F,), jnp.float32),
            w_ffn2=jax.random.normal(kb[9], (C, F), jnp.float32) * F ** -0.5,
            b_ffn2=jnp.zeros((C,), jnp.float32),
        ))
    return raw


if __name__ == "__main__":
    cfg = dict(vocab_size=256, ctx_len=16, embed_dim=32, n_heads=4,
               n_layers=2, drop_rate=0.0)
    B, N = 2, 8

    key = jax.random.PRNGKey(0)
    k_params, k_tok = jax.random.split(key)
    raw = init_raw_params(k_params, cfg)
    token_ids = jax.random.randint(k_tok, (B, N), 0, cfg['vocab_size'], dtype=jnp.int32)

    # one-time weight prep (de-interleave, transpose, head-split, scale, bf16)
    prepped = prepare_gpt_params(raw, n_heads=cfg['n_heads'])

    fwd = jax.jit(lambda toks, prm: gpt_forward(toks, prm, n_heads=cfg['n_heads']))
    logits = jax.block_until_ready(fwd(token_ids, prepped))

    ref = gpt_reference(token_ids, raw, n_heads=cfg['n_heads'])

    assert logits.shape == (B, N, cfg['vocab_size']), logits.shape
    assert bool(jnp.all(jnp.isfinite(logits)))
    max_err = float(jnp.max(jnp.abs(logits - ref)))
    assert jnp.allclose(logits, ref, rtol=2e-2, atol=2e-2), max_err

    print("KERNEL_OK")
</pallas_src>

<mosaic_0001>
module attributes {stable_mosaic.version = 11 : i64} {
  func.func @_lm_head_kernel(%arg0: i32, %arg1: memref<2x8x32xf32, #tpu.memory_space<vmem>>, %arg2: memref<1x32xf32, #tpu.memory_space<vmem>>, %arg3: memref<1x32xf32, #tpu.memory_space<vmem>>, %arg4: memref<32x256xbf16, #tpu.memory_space<vmem>>, %arg5: memref<2x8x256xf32, #tpu.memory_space<vmem>>) attributes {dimension_semantics = [#tpu.dimension_semantics<parallel>], iteration_bounds = array<i64: 1>, scalar_prefetch = 0 : i64, scratch_operands = 0 : i64, tpu.core_type = #tpu.core_type<tc>, window_params = [{transform_indices = @transform_0, window_bounds = array<i64: 2, 8, 32>}, {pipeline_mode = #tpu.pipeline_mode<synchronous>, transform_indices = @transform_1, window_bounds = array<i64: 1, 32>}, {pipeline_mode = #tpu.pipeline_mode<synchronous>, transform_indices = @transform_2, window_bounds = array<i64: 1, 32>}, {pipeline_mode = #tpu.pipeline_mode<synchronous>, transform_indices = @transform_3, window_bounds = array<i64: 32, 256>}, {transform_indices = @transform_4, window_bounds = array<i64: 2, 8, 256>}]} {
    %c0 = arith.constant 0 : index
    %c0_0 = arith.constant 0 : index
    %c0_1 = arith.constant 0 : index
    %0 = vector.load %arg1[%c0, %c0_0, %c0_1] : memref<2x8x32xf32, #tpu.memory_space<vmem>>, vector<2x8x32xf32>
    %1 = vector.shape_cast %0 : vector<2x8x32xf32> to vector<16x32xf32>
    %c0_2 = arith.constant 0 : index
    %c0_3 = arith.constant 0 : index
    %2 = vector.load %arg2[%c0_2, %c0_3] : memref<1x32xf32, #tpu.memory_space<vmem>>, vector<1x32xf32>
    %c0_4 = arith.constant 0 : index
    %c0_5 = arith.constant 0 : index
    %3 = vector.load %arg3[%c0_4, %c0_5] : memref<1x32xf32, #tpu.memory_space<vmem>>, vector<1x32xf32>
    %cst = arith.constant dense<0.000000e+00> : vector<16xf32>
    %4 = vector.multi_reduction <add>, %1, %cst [1] : vector<16x32xf32> to vector<16xf32>
    %5 = vector.shape_cast %4 : vector<16xf32> to vector<16x1xf32>
    %cst_6 = arith.constant 3.200000e+01 : f32
    %6 = vector.broadcast %cst_6 : f32 to vector<16x1xf32>
    %7 = arith.divf %5, %6 : vector<16x1xf32>
    %8 = vector.broadcast %7 : vector<16x1xf32> to vector<16x32xf32>
    %9 = arith.subf %1, %8 : vector<16x32xf32>
    %10 = arith.mulf %9, %9 : vector<16x32xf32>
    %cst_7 = arith.constant dense<0.000000e+00> : vector<16xf32>
    %11 = vector.multi_reduction <add>, %10, %cst_7 [1] : vector<16x32xf32> to vector<16xf32>
    %12 = vector.shape_cast %11 : vector<16xf32> to vector<16x1xf32>
    %cst_8 = arith.constant 3.200000e+01 : f32
    %13 = vector.broadcast %cst_8 : f32 to vector<16x1xf32>
    %14 = arith.divf %12, %13 : vector<16x1xf32>
    %15 = vector.broadcast %7 : vector<16x1xf32> to vector<16x32xf32>
    %16 = arith.subf %1, %15 : vector<16x32xf32>
    %cst_9 = arith.constant 9.99999974E-6 : f32
    %17 = vector.broadcast %cst_9 : f32 to vector<16x1xf32>
    %18 = arith.addf %14, %17 : vector<16x1xf32>
    %19 = math.rsqrt %18 : vector<16x1xf32>
    %20 = vector.broadcast %19 : vector<16x1xf32> to vector<16x32xf32>
    %21 = arith.mulf %16, %20 : vector<16x32xf32>
    %22 = vector.broadcast %2 : vector<1x32xf32> to vector<16x32xf32>
    %23 = arith.mulf %21, %22 : vector<16x32xf32>
    %24 = vector.broadcast %3 : vector<1x32xf32> to vector<16x32xf32>
    %25 = arith.addf %23, %24 : vector<16x32xf32>
    %26 = arith.truncf %25 : vector<16x32xf32> to vector<16x32xbf16>
    %c0_10 = arith.constant 0 : index
    %c0_11 = arith.constant 0 : index
    %27 = vector.load %arg4[%c0_10, %c0_11] : memref<32x256xbf16, #tpu.memory_space<vmem>>, vector<32x256xbf16>
    %cst_12 = arith.constant dense<0.000000e+00> : vector<16x256xf32>
    %28 = tpu.matmul %26, %27, %cst_12 {dimension_numbers = #tpu.dot_dimension_numbers<[1], [0], [0], [1], [0, 0, 1, 1], [], []>} : vector<16x32xbf16>, vector<32x256xbf16>, vector<16x256xf32> -> vector<16x256xf32>
    %29 = vector.shape_cast %28 : vector<16x256xf32> to vector<2x8x256xf32>
    %c0_13 = arith.constant 0 : index
    %c0_14 = arith.constant 0 : index
    %c0_15 = arith.constant 0 : index
    %30 = vector.load %arg5[%c0_13, %c0_14, %c0_15] : memref<2x8x256xf32, #tpu.memory_space<vmem>>, vector<2x8x256xf32>
    tpu.vector_store %arg5[%c0_13, %c0_14, %c0_15], %29 {strides = array<i32>} : memref<2x8x256xf32, #tpu.memory_space<vmem>>, vector<2x8x256xf32>,
    return
  }
  func.func @transform_0(%arg0: i32) -> (i32, i32, i32) {
    %c0_i32 = arith.constant 0 : i32
    %c0_i32_0 = arith.constant 0 : i32
    %c0_i32_1 = arith.constant 0 : i32
    return %arg0, %c0_i32, %c0_i32_0 : i32, i32, i32
  }
  func.func @transform_1(%arg0: i32) -> (i32, i32) {
    %c0_i32 = arith.constant 0 : i32
    %c0_i32_0 = arith.constant 0 : i32
    %c0_i32_1 = arith.constant 0 : i32
    return %c0_i32, %c0_i32_0 : i32, i32
  }
  func.func @transform_2(%arg0: i32) -> (i32, i32) {
    %c0_i32 = arith.constant 0 : i32
    %c0_i32_0 = arith.constant 0 : i32
    %c0_i32_1 = arith.constant 0 : i32
    return %c0_i32, %c0_i32_0 : i32, i32
  }
  func.func @transform_3(%arg0: i32) -> (i32, i32) {
    %c0_i32 = arith.constant 0 : i32
    %c0_i32_0 = arith.constant 0 : i32
    %c0_i32_1 = arith.constant 0 : i32
    return %c0_i32, %c0_i32_0 : i32, i32
  }
  func.func @transform_4(%arg0: i32) -> (i32, i32, i32) {
    %c0_i32 = arith.constant 0 : i32
    %c0_i32_0 = arith.constant 0 : i32
    %c0_i32_1 = arith.constant 0 : i32
    return %arg0, %c0_i32, %c0_i32_0 : i32, i32, i32
  }
}

module attributes {stable_mosaic.version = 11 : i64} {
  func.func @_block_kernel(%arg0: i32, %arg1: memref<2x8x32xf32, #tpu.memory_space<vmem>>, %arg2: memref<1x32xf32, #tpu.memory_space<vmem>>, %arg3: memref<1x32xf32, #tpu.memory_space<vmem>>, %arg4: memref<32x32xbf16, #tpu.memory_space<vmem>>, %arg5: memref<32x32xbf16, #tpu.memory_space<vmem>>, %arg6: memref<32x32xbf16, #tpu.memory_space<vmem>>, %arg7: memref<4x8x32xbf16, #tpu.memory_space<vmem>>, %arg8: memref<1x32xf32, #tpu.memory_space<vmem>>, %arg9: memref<1x32xf32, #tpu.memory_space<vmem>>, %arg10: memref<1x32xf32, #tpu.memory_space<vmem>>, %arg11: memref<32x128xbf16, #tpu.memory_space<vmem>>, %arg12: memref<1x128xf32, #tpu.memory_space<vmem>>, %arg13: memref<128x32xbf16, #tpu.memory_space<vmem>>, %arg14: memref<1x32xf32, #tpu.memory_space<vmem>>, %arg15: memref<2x8x32xf32, #tpu.memory_space<vmem>>) attributes {dimension_semantics = [#tpu.dimension_semantics<parallel>], iteration_bounds = array<i64: 1>, scalar_prefetch = 0 : i64, scratch_operands = 0 : i64, tpu.core_type = #tpu.core_type<tc>, window_params = [{transform_indices = @transform_0, window_bounds = array<i64: 2, 8, 32>}, {pipeline_mode = #tpu.pipeline_mode<synchronous>, transform_indices = @transform_1, window_bounds = array<i64: 1, 32>}, {pipeline_mode = #tpu.pipeline_mode<synchronous>, transform_indices = @transform_2, window_bounds = array<i64: 1, 32>}, {pipeline_mode = #tpu.pipeline_mode<synchronous>, transform_indices = @transform_3, window_bounds = array<i64: 32, 32>}, {pipeline_mode = #tpu.pipeline_mode<synchronous>, transform_indices = @transform_4, window_bounds = array<i64: 32, 32>}, {pipeline_mode = #tpu.pipeline_mode<synchronous>, transform_indices = @transform_5, window_bounds = array<i64: 32, 32>}, {pipeline_mode = #tpu.pipeline_mode<synchronous>, transform_indices = @transform_6, window_bounds = array<i64: 4, 8, 32>}, {pipeline_mode = #tpu.pipeline_mode<synchronous>, transform_indices = @transform_7, window_bounds = array<i64: 1, 32>}, {pipeline_mode = #tpu.pipeline_mode<synchronous>, transform_indices = @transform_8, window_bounds = array<i64: 1, 32>}, {pipeline_mode = #tpu.pipeline_mode<synchronous>, transform_indices = @transform_9, window_bounds = array<i64: 1, 32>}, {pipeline_mode = #tpu.pipeline_mode<synchronous>, transform_indices = @transform_10, window_bounds = array<i64: 32, 128>}, {pipeline_mode = #tpu.pipeline_mode<synchronous>, transform_indices = @transform_11, window_bounds = array<i64: 1, 128>}, {pipeline_mode = #tpu.pipeline_mode<synchronous>, transform_indices = @transform_12, window_bounds = array<i64: 128, 32>}, {pipeline_mode = #tpu.pipeline_mode<synchronous>, transform_indices = @transform_13, window_bounds = array<i64: 1, 32>}, {transform_indices = @transform_14, window_bounds = array<i64: 2, 8, 32>}]} {
    %c0 = arith.constant 0 : index
    %c0_0 = arith.constant 0 : index
    %c0_1 = arith.constant 0 : index
    %0 = vector.load %arg1[%c0, %c0_0, %c0_1] : memref<2x8x32xf32, #tpu.memory_space<vmem>>, vector<2x8x32xf32>
    %1 = vector.shape_cast %0 : vector<2x8x32xf32> to vector<16x32xf32>
    %c0_2 = arith.constant 0 : index
    %c0_3 = arith.constant 0 : index
    %2 = vector.load %arg2[%c0_2, %c0_3] : memref<1x32xf32, #tpu.memory_space<vmem>>, vector<1x32xf32>
    %c0_4 = arith.constant 0 : index
    %c0_5 = arith.constant 0 : index
    %3 = vector.load %arg3[%c0_4, %c0_5] : memref<1x32xf32, #tpu.memory_space<vmem>>, vector<1x32xf32>
    %cst = arith.constant dense<0.000000e+00> : vector<16xf32>
    %4 = vector.multi_reduction <add>, %1, %cst [1] : vector<16x32xf32> to vector<16xf32>
    %5 = vector.shape_cast %4 : vector<16xf32> to vector<16x1xf32>
    %cst_6 = arith.constant 3.200000e+01 : f32
    %6 = vector.broadcast %cst_6 : f32 to vector<16x1xf32>
    %7 = arith.divf %5, %6 : vector<16x1xf32>
    %8 = vector.broadcast %7 : vector<16x1xf32> to vector<16x32xf32>
    %9 = arith.subf %1, %8 : vector<16x32xf32>
    %10 = arith.mulf %9, %9 : vector<16x32xf32>
    %cst_7 = arith.constant dense<0.000000e+00> : vector<16xf32>
    %11 = vector.multi_reduction <add>, %10, %cst_7 [1] : vector<16x32xf32> to vector<16xf32>
    %12 = vector.shape_cast %11 : vector<16xf32> to vector<16x1xf32>
    %cst_8 = arith.constant 3.200000e+01 : f32
    %13 = vector.broadcast %cst_8 : f32 to vector<16x1xf32>
    %14 = arith.divf %12, %13 : vector<16x1xf32>
    %15 = vector.broadcast %7 : vector<16x1xf32> to vector<16x32xf32>
    %16 = arith.subf %1, %15 : vector<16x32xf32>
    %cst_9 = arith.constant 9.99999974E-6 : f32
    %17 = vector.broadcast %cst_9 : f32 to vector<16x1xf32>
    %18 = arith.addf %14, %17 : vector<16x1xf32>
    %19 = math.rsqrt %18 : vector<16x1xf32>
    %20 = vector.broadcast %19 : vector<16x1xf32> to vector<16x32xf32>
    %21 = arith.mulf %16, %20 : vector<16x32xf32>
    %22 = vector.broadcast %2 : vector<1x32xf32> to vector<16x32xf32>
    %23 = arith.mulf %21, %22 : vector<16x32xf32>
    %24 = vector.broadcast %3 : vector<1x32xf32> to vector<16x32xf32>
    %25 = arith.addf %23, %24 : vector<16x32xf32>
    %26 = arith.truncf %25 : vector<16x32xf32> to vector<16x32xbf16>
    %c0_10 = arith.constant 0 : index
    %c0_11 = arith.constant 0 : index
    %27 = vector.load %arg4[%c0_10, %c0_11] : memref<32x32xbf16, #tpu.memory_space<vmem>>, vector<32x32xbf16>
    %cst_12 = arith.constant dense<0.000000e+00> : vector<16x32xf32>
    %28 = tpu.matmul %26, %27, %cst_12 {dimension_numbers = #tpu.dot_dimension_numbers<[1], [0], [0], [1], [0, 0, 1, 1], [], []>} : vector<16x32xbf16>, vector<32x32xbf16>, vector<16x32xf32> -> vector<16x32xf32>
    %c0_13 = arith.constant 0 : index
    %c0_14 = arith.constant 0 : index
    %29 = vector.load %arg5[%c0_13, %c0_14] : memref<32x32xbf16, #tpu.memory_space<vmem>>, vector<32x32xbf16>
    %cst_15 = arith.constant dense<0.000000e+00> : vector<16x32xf32>
    %30 = tpu.matmul %26, %29, %cst_15 {dimension_numbers = #tpu.dot_dimension_numbers<[1], [0], [0], [1], [0, 0, 1, 1], [], []>} : vector<16x32xbf16>, vector<32x32xbf16>, vector<16x32xf32> -> vector<16x32xf32>
    %c0_16 = arith.constant 0 : index
    %c0_17 = arith.constant 0 : index
    %31 = vector.load %arg6[%c0_16, %c0_17] : memref<32x32xbf16, #tpu.memory_space<vmem>>, vector<32x32xbf16>
    %cst_18 = arith.constant dense<0.000000e+00> : vector<16x32xf32>
    %32 = tpu.matmul %26, %31, %cst_18 {dimension_numbers = #tpu.dot_dimension_numbers<[1], [0], [0], [1], [0, 0, 1, 1], [], []>} : vector<16x32xbf16>, vector<32x32xbf16>, vector<16x32xf32> -> vector<16x32xf32>
    %33 = tpu.iota {dimensions = array<i32: 0>} : vector<8x8xi32>
    %34 = tpu.iota {dimensions = array<i32: 1>} : vector<8x8xi32>
    %35 = arith.cmpi sge, %33, %34 : vector<8x8xi32>
    %cst_19 = arith.constant 0.000000e+00 : f32
    %36 = vector.broadcast %cst_19 : f32 to vector<16x32xf32>
    %37 = vector.extract_strided_slice %28 {offsets = [0, 0], sizes = [16, 8], strides = [1, 1]} : vector<16x32xf32> to vector<16x8xf32>
    %38 = vector.shape_cast %37 : vector<16x8xf32> to vector<2x8x8xf32>
    %39 = arith.truncf %38 : vector<2x8x8xf32> to vector<2x8x8xbf16>
    %40 = vector.extract_strided_slice %30 {offsets = [0, 0], sizes = [16, 8], strides = [1, 1]} : vector<16x32xf32> to vector<16x8xf32>
    %41 = vector.shape_cast %40 : vector<16x8xf32> to vector<2x8x8xf32>
    %42 = arith.truncf %41 : vector<2x8x8xf32> to vector<2x8x8xbf16>
    %43 = vector.extract_strided_slice %32 {offsets = [0, 0], sizes = [16, 8], strides = [1, 1]} : vector<16x32xf32> to vector<16x8xf32>
    %44 = vector.shape_cast %43 : vector<16x8xf32> to vector<2x8x8xf32>
    %45 = arith.truncf %44 : vector<2x8x8xf32> to vector<2x8x8xbf16>
    "tpu.trace_start"() <{level = 10 : i32, message = "bnd,bmd->bnm"}> : () -> ()
    %cst_20 = arith.constant dense<0.000000e+00> : vector<2x8x8xf32>
    %46 = tpu.matmul %39, %42, %cst_20 {dimension_numbers = #tpu.dot_dimension_numbers<[2], [2], [1], [1], [0, 0, 0, 1, 1, 1], [0], [0]>} : vector<2x8x8xbf16>, vector<2x8x8xbf16>, vector<2x8x8xf32> -> vector<2x8x8xf32>
    %cst_21 = arith.constant -1.000000e+30 : f32
    "tpu.trace_stop"() : () -> ()
    %47 = vector.shape_cast %35 : vector<8x8xi1> to vector<1x8x8xi1>
    %48 = vector.broadcast %47 : vector<1x8x8xi1> to vector<2x8x8xi1>
    %49 = vector.broadcast %cst_21 : f32 to vector<2x8x8xf32>
    %50 = arith.select %48, %46, %49 : vector<2x8x8xi1>, vector<2x8x8xf32>
    %cst_22 = arith.constant dense<0xFF800000> : vector<2x8xf32>
    %51 = vector.multi_reduction <maximumf>, %50, %cst_22 [2] : vector<2x8x8xf32> to vector<2x8xf32>
    %52 = vector.shape_cast %51 : vector<2x8xf32> to vector<2x8x1xf32>
    %53 = vector.broadcast %52 : vector<2x8x1xf32> to vector<2x8x8xf32>
    %54 = arith.subf %50, %53 : vector<2x8x8xf32>
    %55 = math.exp %54 : vector<2x8x8xf32>
    %cst_23 = arith.constant dense<0.000000e+00> : vector<2x8xf32>
    %56 = vector.multi_reduction <add>, %55, %cst_23 [2] : vector<2x8x8xf32> to vector<2x8xf32>
    %57 = vector.shape_cast %56 : vector<2x8xf32> to vector<2x8x1xf32>
    %58 = tpu.reciprocal %57 {approx = true} : vector<2x8x1xf32> -> vector<2x8x1xf32>
    %59 = vector.broadcast %58 : vector<2x8x1xf32> to vector<2x8x8xf32>
    %60 = arith.mulf %55, %59 : vector<2x8x8xf32>
    %61 = arith.truncf %60 : vector<2x8x8xf32> to vector<2x8x8xbf16>
    "tpu.trace_start"() <{level = 10 : i32, message = "bnm,bmd->bnd"}> : () -> ()
    %cst_24 = arith.constant dense<0.000000e+00> : vector<2x8x8xf32>
    %62 = tpu.matmul %61, %45, %cst_24 {dimension_numbers = #tpu.dot_dimension_numbers<[2], [1], [1], [2], [0, 0, 0, 1, 1, 2], [0], [0]>} : vector<2x8x8xbf16>, vector<2x8x8xbf16>, vector<2x8x8xf32> -> vector<2x8x8xf32>
    "tpu.trace_stop"() : () -> ()
    %63 = vector.shape_cast %62 : vector<2x8x8xf32> to vector<16x8xf32>
    %64 = arith.truncf %63 : vector<16x8xf32> to vector<16x8xbf16>
    %c0_25 = arith.constant 0 : index
    %c0_26 = arith.constant 0 : index
    %c0_27 = arith.constant 0 : index
    %65 = vector.load %arg7[%c0_25, %c0_26, %c0_27] : memref<4x8x32xbf16, #tpu.memory_space<vmem>>, vector<1x8x32xbf16>
    %66 = vector.shape_cast %65 : vector<1x8x32xbf16> to vector<8x32xbf16>
    %cst_28 = arith.constant dense<0.000000e+00> : vector<16x32xf32>
    %67 = tpu.matmul %64, %66, %cst_28 {dimension_numbers = #tpu.dot_dimension_numbers<[1], [0], [0], [1], [0, 0, 1, 1], [], []>} : vector<16x8xbf16>, vector<8x32xbf16>, vector<16x32xf32> -> vector<16x32xf32>
    %68 = arith.addf %36, %67 : vector<16x32xf32>
    %69 = vector.extract_strided_slice %28 {offsets = [0, 8], sizes = [16, 8], strides = [1, 1]} : vector<16x32xf32> to vector<16x8xf32>
    %70 = vector.shape_cast %69 : vector<16x8xf32> to vector<2x8x8xf32>
    %71 = arith.truncf %70 : vector<2x8x8xf32> to vector<2x8x8xbf16>
    %72 = vector.extract_strided_slice %30 {offsets = [0, 8], sizes = [16, 8], strides = [1, 1]} : vector<16x32xf32> to vector<16x8xf32>
    %73 = vector.shape_cast %72 : vector<16x8xf32> to vector<2x8x8xf32>
    %74 = arith.truncf %73 : vector<2x8x8xf32> to vector<2x8x8xbf16>
    %75 = vector.extract_strided_slice %32 {offsets = [0, 8], sizes = [16, 8], strides = [1, 1]} : vector<16x32xf32> to vector<16x8xf32>
    %76 = vector.shape_cast %75 : vector<16x8xf32> to vector<2x8x8xf32>
    %77 = arith.truncf %76 : vector<2x8x8xf32> to vector<2x8x8xbf16>
    "tpu.trace_start"() <{level = 10 : i32, message = "bnd,bmd->bnm"}> : () -> ()
    %cst_29 = arith.constant dense<0.000000e+00> : vector<2x8x8xf32>
    %78 = tpu.matmul %71, %74, %cst_29 {dimension_numbers = #tpu.dot_dimension_numbers<[2], [2], [1], [1], [0, 0, 0, 1, 1, 1], [0], [0]>} : vector<2x8x8xbf16>, vector<2x8x8xbf16>, vector<2x8x8xf32> -> vector<2x8x8xf32>
    %cst_30 = arith.constant -1.000000e+30 : f32
    "tpu.trace_stop"() : () -> ()
    %79 = vector.shape_cast %35 : vector<8x8xi1> to vector<1x8x8xi1>
    %80 = vector.broadcast %79 : vector<1x8x8xi1> to vector<2x8x8xi1>
    %81 = vector.broadcast %cst_30 : f32 to vector<2x8x8xf32>
    %82 = arith.select %80, %78, %81 : vector<2x8x8xi1>, vector<2x8x8xf32>
    %cst_31 = arith.constant dense<0xFF800000> : vector<2x8xf32>
    %83 = vector.multi_reduction <maximumf>, %82, %cst_31 [2] : vector<2x8x8xf32> to vector<2x8xf32>
    %84 = vector.shape_cast %83 : vector<2x8xf32> to vector<2x8x1xf32>
    %85 = vector.broadcast %84 : vector<2x8x1xf32> to vector<2x8x8xf32>
    %86 = arith.subf %82, %85 : vector<2x8x8xf32>
    %87 = math.exp %86 : vector<2x8x8xf32>
    %cst_32 = arith.constant dense<0.000000e+00> : vector<2x8xf32>
    %88 = vector.multi_reduction <add>, %87, %cst_32 [2] : vector<2x8x8xf32> to vector<2x8xf32>
    %89 = vector.shape_cast %88 : vector<2x8xf32> to vector<2x8x1xf32>
    %90 = tpu.reciprocal %89 {approx = true} : vector<2x8x1xf32> -> vector<2x8x1xf32>
    %91 = vector.broadcast %90 : vector<2x8x1xf32> to vector<2x8x8xf32>
    %92 = arith.mulf %87, %91 : vector<2x8x8xf32>
    %93 = arith.truncf %92 : vector<2x8x8xf32> to vector<2x8x8xbf16>
    "tpu.trace_start"() <{level = 10 : i32, message = "bnm,bmd->bnd"}> : () -> ()
    %cst_33 = arith.constant dense<0.000000e+00> : vector<2x8x8xf32>
    %94 = tpu.matmul %93, %77, %cst_33 {dimension_numbers = #tpu.dot_dimension_numbers<[2], [1], [1], [2], [0, 0, 0, 1, 1, 2], [0], [0]>} : vector<2x8x8xbf16>, vector<2x8x8xbf16>, vector<2x8x8xf32> -> vector<2x8x8xf32>
    "tpu.trace_stop"() : () -> ()
    %95 = vector.shape_cast %94 : vector<2x8x8xf32> to vector<16x8xf32>
    %96 = arith.truncf %95 : vector<16x8xf32> to vector<16x8xbf16>
    %c1 = arith.constant 1 : index
    %c0_34 = arith.constant 0 : index
    %c0_35 = arith.constant 0 : index
    %97 = vector.load %arg7[%c1, %c0_34, %c0_35] : memref<4x8x32xbf16, #tpu.memory_space<vmem>>, vector<1x8x32xbf16>
    %98 = vector.shape_cast %97 : vector<1x8x32xbf16> to vector<8x32xbf16>
    %cst_36 = arith.constant dense<0.000000e+00> : vector<16x32xf32>
    %99 = tpu.matmul %96, %98, %cst_36 {dimension_numbers = #tpu.dot_dimension_numbers<[1], [0], [0], [1], [0, 0, 1, 1], [], []>} : vector<16x8xbf16>, vector<8x32xbf16>, vector<16x32xf32> -> vector<16x32xf32>
    %100 = arith.addf %68, %99 : vector<16x32xf32>
    %101 = vector.extract_strided_slice %28 {offsets = [0, 16], sizes = [16, 8], strides = [1, 1]} : vector<16x32xf32> to vector<16x8xf32>
    %102 = vector.shape_cast %101 : vector<16x8xf32> to vector<2x8x8xf32>
    %103 = arith.truncf %102 : vector<2x8x8xf32> to vector<2x8x8xbf16>
    %104 = vector.extract_strided_slice %30 {offsets = [0, 16], sizes = [16, 8], strides = [1, 1]} : vector<16x32xf32> to vector<16x8xf32>
    %105 = vector.shape_cast %104 : vector<16x8xf32> to vector<2x8x8xf32>
    %106 = arith.truncf %105 : vector<2x8x8xf32> to vector<2x8x8xbf16>
    %107 = vector.extract_strided_slice %32 {offsets = [0, 16], sizes = [16, 8], strides = [1, 1]} : vector<16x32xf32> to vector<16x8xf32>
    %108 = vector.shape_cast %107 : vector<16x8xf32> to vector<2x8x8xf32>
    %109 = arith.truncf %108 : vector<2x8x8xf32> to vector<2x8x8xbf16>
    "tpu.trace_start"() <{level = 10 : i32, message = "bnd,bmd->bnm"}> : () -> ()
    %cst_37 = arith.constant dense<0.000000e+00> : vector<2x8x8xf32>
    %110 = tpu.matmul %103, %106, %cst_37 {dimension_numbers = #tpu.dot_dimension_numbers<[2], [2], [1], [1], [0, 0, 0, 1, 1, 1], [0], [0]>} : vector<2x8x8xbf16>, vector<2x8x8xbf16>, vector<2x8x8xf32> -> vector<2x8x8xf32>
    %cst_38 = arith.constant -1.000000e+30 : f32
    "tpu.trace_stop"() : () -> ()
    %111 = vector.shape_cast %35 : vector<8x8xi1> to vector<1x8x8xi1>
    %112 = vector.broadcast %111 : vector<1x8x8xi1> to vector<2x8x8xi1>
    %113 = vector.broadcast %cst_38 : f32 to vector<2x8x8xf32>
    %114 = arith.select %112, %110, %113 : vector<2x8x8xi1>, vector<2x8x8xf32>
    %cst_39 = arith.constant dense<0xFF800000> : vector<2x8xf32>
    %115 = vector.multi_reduction <maximumf>, %114, %cst_39 [2] : vector<2x8x8xf32> to vector<2x8xf32>
    %116 = vector.shape_cast %115 : vector<2x8xf32> to vector<2x8x1xf32>
    %117 = vector.broadcast %116 : vector<2x8x1xf32> to vector<2x8x8xf32>
    %118 = arith.subf %114, %117 : vector<2x8x8xf32>
    %119 = math.exp %118 : vector<2x8x8xf32>
    %cst_40 = arith.constant dense<0.000000e+00> : vector<2x8xf32>
    %120 = vector.multi_reduction <add>, %119, %cst_40 [2] : vector<2x8x8xf32> to vector<2x8xf32>
    %121 = vector.shape_cast %120 : vector<2x8xf32> to vector<2x8x1xf32>
    %122 = tpu.reciprocal %121 {approx = true} : vector<2x8x1xf32> -> vector<2x8x1xf32>
    %123 = vector.broadcast %122 : vector<2x8x1xf32> to vector<2x8x8xf32>
    %124 = arith.mulf %119, %123 : vector<2x8x8xf32>
    %125 = arith.truncf %124 : vector<2x8x8xf32> to vector<2x8x8xbf16>
    "tpu.trace_start"() <{level = 10 : i32, message = "bnm,bmd->bnd"}> : () -> ()
    %cst_41 = arith.constant dense<0.000000e+00> : vector<2x8x8xf32>
    %126 = tpu.matmul %125, %109, %cst_41 {dimension_numbers = #tpu.dot_dimension_numbers<[2], [1], [1], [2], [0, 0, 0, 1, 1, 2], [0], [0]>} : vector<2x8x8xbf16>, vector<2x8x8xbf16>, vector<2x8x8xf32> -> vector<2x8x8xf32>
    "tpu.trace_stop"() : () -> ()
    %127 = vector.shape_cast %126 : vector<2x8x8xf32> to vector<16x8xf32>
    %128 = arith.truncf %127 : vector<16x8xf32> to vector<16x8xbf16>
    %c2 = arith.constant 2 : index
    %c0_42 = arith.constant 0 : index
    %c0_43 = arith.constant 0 : index
    %129 = vector.load %arg7[%c2, %c0_42, %c0_43] : memref<4x8x32xbf16, #tpu.memory_space<vmem>>, vector<1x8x32xbf16>
    %130 = vector.shape_cast %129 : vector<1x8x32xbf16> to vector<8x32xbf16>
    %cst_44 = arith.constant dense<0.000000e+00> : vector<16x32xf32>
    %131 = tpu.matmul %128, %130, %cst_44 {dimension_numbers = #tpu.dot_dimension_numbers<[1], [0], [0], [1], [0, 0, 1, 1], [], []>} : vector<16x8xbf16>, vector<8x32xbf16>, vector<16x32xf32> -> vector<16x32xf32>
    %132 = arith.addf %100, %131 : vector<16x32xf32>
    %133 = vector.extract_strided_slice %28 {offsets = [0, 24], sizes = [16, 8], strides = [1, 1]} : vector<16x32xf32> to vector<16x8xf32>
    %134 = vector.shape_cast %133 : vector<16x8xf32> to vector<2x8x8xf32>
    %135 = arith.truncf %134 : vector<2x8x8xf32> to vector<2x8x8xbf16>
    %136 = vector.extract_strided_slice %30 {offsets = [0, 24], sizes = [16, 8], strides = [1, 1]} : vector<16x32xf32> to vector<16x8xf32>
    %137 = vector.shape_cast %136 : vector<16x8xf32> to vector<2x8x8xf32>
    %138 = arith.truncf %137 : vector<2x8x8xf32> to vector<2x8x8xbf16>
    %139 = vector.extract_strided_slice %32 {offsets = [0, 24], sizes = [16, 8], strides = [1, 1]} : vector<16x32xf32> to vector<16x8xf32>
    %140 = vector.shape_cast %139 : vector<16x8xf32> to vector<2x8x8xf32>
    %141 = arith.truncf %140 : vector<2x8x8xf32> to vector<2x8x8xbf16>
    "tpu.trace_start"() <{level = 10 : i32, message = "bnd,bmd->bnm"}> : () -> ()
    %cst_45 = arith.constant dense<0.000000e+00> : vector<2x8x8xf32>
    %142 = tpu.matmul %135, %138, %cst_45 {dimension_numbers = #tpu.dot_dimension_numbers<[2], [2], [1], [1], [0, 0, 0, 1, 1, 1], [0], [0]>} : vector<2x8x8xbf16>, vector<2x8x8xbf16>, vector<2x8x8xf32> -> vector<2x8x8xf32>
    %cst_46 = arith.constant -1.000000e+30 : f32
    "tpu.trace_stop"() : () -> ()
    %143 = vector.shape_cast %35 : vector<8x8xi1> to vector<1x8x8xi1>
    %144 = vector.broadcast %143 : vector<1x8x8xi1> to vector<2x8x8xi1>
    %145 = vector.broadcast %cst_46 : f32 to vector<2x8x8xf32>
    %146 = arith.select %144, %142, %145 : vector<2x8x8xi1>, vector<2x8x8xf32>
    %cst_47 = arith.constant dense<0xFF800000> : vector<2x8xf32>
    %147 = vector.multi_reduction <maximumf>, %146, %cst_47 [2] : vector<2x8x8xf32> to vector<2x8xf32>
    %148 = vector.shape_cast %147 : vector<2x8xf32> to vector<2x8x1xf32>
    %149 = vector.broadcast %148 : vector<2x8x1xf32> to vector<2x8x8xf32>
    %150 = arith.subf %146, %149 : vector<2x8x8xf32>
    %151 = math.exp %150 : vector<2x8x8xf32>
    %cst_48 = arith.constant dense<0.000000e+00> : vector<2x8xf32>
    %152 = vector.multi_reduction <add>, %151, %cst_48 [2] : vector<2x8x8xf32> to vector<2x8xf32>
    %153 = vector.shape_cast %152 : vector<2x8xf32> to vector<2x8x1xf32>
    %154 = tpu.reciprocal %153 {approx = true} : vector<2x8x1xf32> -> vector<2x8x1xf32>
    %155 = vector.broadcast %154 : vector<2x8x1xf32> to vector<2x8x8xf32>
    %156 = arith.mulf %151, %155 : vector<2x8x8xf32>
    %157 = arith.truncf %156 : vector<2x8x8xf32> to vector<2x8x8xbf16>
    "tpu.trace_start"() <{level = 10 : i32, message = "bnm,bmd->bnd"}> : () -> ()
    %cst_49 = arith.constant dense<0.000000e+00> : vector<2x8x8xf32>
    %158 = tpu.matmul %157, %141, %cst_49 {dimension_numbers = #tpu.dot_dimension_numbers<[2], [1], [1], [2], [0, 0, 0, 1, 1, 2], [0], [0]>} : vector<2x8x8xbf16>, vector<2x8x8xbf16>, vector<2x8x8xf32> -> vector<2x8x8xf32>
    "tpu.trace_stop"() : () -> ()
    %159 = vector.shape_cast %158 : vector<2x8x8xf32> to vector<16x8xf32>
    %160 = arith.truncf %159 : vector<16x8xf32> to vector<16x8xbf16>
    %c3 = arith.constant 3 : index
    %c0_50 = arith.constant 0 : index
    %c0_51 = arith.constant 0 : index
    %161 = vector.load %arg7[%c3, %c0_50, %c0_51] : memref<4x8x32xbf16, #tpu.memory_space<vmem>>, vector<1x8x32xbf16>
    %162 = vector.shape_cast %161 : vector<1x8x32xbf16> to vector<8x32xbf16>
    %cst_52 = arith.constant dense<0.000000e+00> : vector<16x32xf32>
    %163 = tpu.matmul %160, %162, %cst_52 {dimension_numbers = #tpu.dot_dimension_numbers<[1], [0], [0], [1], [0, 0, 1, 1], [], []>} : vector<16x8xbf16>, vector<8x32xbf16>, vector<16x32xf32> -> vector<16x32xf32>
    %164 = arith.addf %132, %163 : vector<16x32xf32>
    %c0_53 = arith.constant 0 : index
    %c0_54 = arith.constant 0 : index
    %165 = vector.load %arg8[%c0_53, %c0_54] : memref<1x32xf32, #tpu.memory_space<vmem>>, vector<1x32xf32>
    %166 = vector.broadcast %165 : vector<1x32xf32> to vector<16x32xf32>
    %167 = arith.addf %164, %166 : vector<16x32xf32>
    %168 = arith.addf %1, %167 : vector<16x32xf32>
    %c0_55 = arith.constant 0 : index
    %c0_56 = arith.constant 0 : index
    %169 = vector.load %arg9[%c0_55, %c0_56] : memref<1x32xf32, #tpu.memory_space<vmem>>, vector<1x32xf32>
    %c0_57 = arith.constant 0 : index
    %c0_58 = arith.constant 0 : index
    %170 = vector.load %arg10[%c0_57, %c0_58] : memref<1x32xf32, #tpu.memory_space<vmem>>, vector<1x32xf32>
    %cst_59 = arith.constant dense<0.000000e+00> : vector<16xf32>
    %171 = vector.multi_reduction <add>, %168, %cst_59 [1] : vector<16x32xf32> to vector<16xf32>
    %172 = vector.shape_cast %171 : vector<16xf32> to vector<16x1xf32>
    %cst_60 = arith.constant 3.200000e+01 : f32
    %173 = vector.broadcast %cst_60 : f32 to vector<16x1xf32>
    %174 = arith.divf %172, %173 : vector<16x1xf32>
    %175 = vector.broadcast %174 : vector<16x1xf32> to vector<16x32xf32>
    %176 = arith.subf %168, %175 : vector<16x32xf32>
    %177 = arith.mulf %176, %176 : vector<16x32xf32>
    %cst_61 = arith.constant dense<0.000000e+00> : vector<16xf32>
    %178 = vector.multi_reduction <add>, %177, %cst_61 [1] : vector<16x32xf32> to vector<16xf32>
    %179 = vector.shape_cast %178 : vector<16xf32> to vector<16x1xf32>
    %cst_62 = arith.constant 3.200000e+01 : f32
    %180 = vector.broadcast %cst_62 : f32 to vector<16x1xf32>
    %181 = arith.divf %179, %180 : vector<16x1xf32>
    %182 = vector.broadcast %174 : vector<16x1xf32> to vector<16x32xf32>
    %183 = arith.subf %168, %182 : vector<16x32xf32>
    %cst_63 = arith.constant 9.99999974E-6 : f32
    %184 = vector.broadcast %cst_63 : f32 to vector<16x1xf32>
    %185 = arith.addf %181, %184 : vector<16x1xf32>
    %186 = math.rsqrt %185 : vector<16x1xf32>
    %187 = vector.broadcast %186 : vector<16x1xf32> to vector<16x32xf32>
    %188 = arith.mulf %183, %187 : vector<16x32xf32>
    %189 = vector.broadcast %169 : vector<1x32xf32> to vector<16x32xf32>
    %190 = arith.mulf %188, %189 : vector<16x32xf32>
    %191 = vector.broadcast %170 : vector<1x32xf32> to vector<16x32xf32>
    %192 = arith.addf %190, %191 : vector<16x32xf32>
    %193 = arith.truncf %192 : vector<16x32xf32> to vector<16x32xbf16>
    %c0_64 = arith.constant 0 : index
    %c0_65 = arith.constant 0 : index
    %194 = vector.load %arg11[%c0_64, %c0_65] : memref<32x128xbf16, #tpu.memory_space<vmem>>, vector<32x128xbf16>
    %cst_66 = arith.constant dense<0.000000e+00> : vector<16x128xf32>
    %195 = tpu.matmul %193, %194, %cst_66 {dimension_numbers = #tpu.dot_dimension_numbers<[1], [0], [0], [1], [0, 0, 1, 1], [], []>} : vector<16x32xbf16>, vector<32x128xbf16>, vector<16x128xf32> -> vector<16x128xf32>
    %c0_67 = arith.constant 0 : index
    %c0_68 = arith.constant 0 : index
    %196 = vector.load %arg12[%c0_67, %c0_68] : memref<1x128xf32, #tpu.memory_space<vmem>>, vector<1x128xf32>
    %197 = vector.broadcast %196 : vector<1x128xf32> to vector<16x128xf32>
    %198 = arith.addf %195, %197 : vector<16x128xf32>
    %cst_69 = arith.constant 5.000000e-01 : f32
    %199 = vector.broadcast %cst_69 : f32 to vector<16x128xf32>
    %200 = arith.mulf %199, %198 : vector<16x128xf32>
    %cst_70 = arith.constant 4.471500e-02 : f32
    %201 = vector.broadcast %cst_70 : f32 to vector<16x128xf32>
    %202 = arith.mulf %201, %198 : vector<16x128xf32>
    %203 = arith.mulf %202, %198 : vector<16x128xf32>
    %204 = arith.mulf %203, %198 : vector<16x128xf32>
    %205 = arith.addf %198, %204 : vector<16x128xf32>
    %cst_71 = arith.constant 0.797884583 : f32
    %206 = vector.broadcast %cst_71 : f32 to vector<16x128xf32>
    %207 = arith.mulf %206, %205 : vector<16x128xf32>
    %208 = math.tanh %207 : vector<16x128xf32>
    %cst_72 = arith.constant 1.000000e+00 : f32
    %209 = vector.broadcast %cst_72 : f32 to vector<16x128xf32>
    %210 = arith.addf %209, %208 : vector<16x128xf32>
    %211 = arith.mulf %200, %210 : vector<16x128xf32>
    %212 = arith.truncf %211 : vector<16x128xf32> to vector<16x128xbf16>
    %c0_73 = arith.constant 0 : index
    %c0_74 = arith.constant 0 : index
    %213 = vector.load %arg13[%c0_73, %c0_74] : memref<128x32xbf16, #tpu.memory_space<vmem>>, vector<128x32xbf16>
    %cst_75 = arith.constant dense<0.000000e+00> : vector<16x32xf32>
    %214 = tpu.matmul %212, %213, %cst_75 {dimension_numbers = #tpu.dot_dimension_numbers<[1], [0], [0], [1], [0, 0, 1, 1], [], []>} : vector<16x128xbf16>, vector<128x32xbf16>, vector<16x32xf32> -> vector<16x32xf32>
    %c0_76 = arith.constant 0 : index
    %c0_77 = arith.constant 0 : index
    %215 = vector.load %arg14[%c0_76, %c0_77] : memref<1x32xf32, #tpu.memory_space<vmem>>, vector<1x32xf32>
    %216 = vector.broadcast %215 : vector<1x32xf32> to vector<16x32xf32>
    %217 = arith.addf %214, %216 : vector<16x32xf32>
    %218 = arith.addf %217, %168 : vector<16x32xf32>
    %219 = vector.shape_cast %218 : vector<16x32xf32> to vector<2x8x32xf32>
    %c0_78 = arith.constant 0 : index
    %c0_79 = arith.constant 0 : index
    %c0_80 = arith.constant 0 : index
    %220 = vector.load %arg15[%c0_78, %c0_79, %c0_80] : memref<2x8x32xf32, #tpu.memory_space<vmem>>, vector<2x8x32xf32>
    tpu.vector_store %arg15[%c0_78, %c0_79, %c0_80], %219 {strides = array<i32>} : memref<2x8x32xf32, #tpu.memory_space<vmem>>, vector<2x8x32xf32>,
    return
  }
  func.func @transform_0(%arg0: i32) -> (i32, i32, i32) {
    %c0_i32 = arith.constant 0 : i32
    %c0_i32_0 = arith.constant 0 : i32
    %c0_i32_1 = arith.constant 0 : i32
    return %arg0, %c0_i32, %c0_i32_0 : i32, i32, i32
  }
  func.func @transform_1(%arg0: i32) -> (i32, i32) {
    %c0_i32 = arith.constant 0 : i32
    %c0_i32_0 = arith.constant 0 : i32
    %c0_i32_1 = arith.constant 0 : i32
    return %c0_i32, %c0_i32_0 : i32, i32
  }
  func.func @transform_2(%arg0: i32) -> (i32, i32) {
    %c0_i32 = arith.constant 0 : i32
    %c0_i32_0 = arith.constant 0 : i32
    %c0_i32_1 = arith.constant 0 : i32
    return %c0_i32, %c0_i32_0 : i32, i32
  }
  func.func @transform_3(%arg0: i32) -> (i32, i32) {
    %c0_i32 = arith.constant 0 : i32
    %c0_i32_0 = arith.constant 0 : i32
    %c0_i32_1 = arith.constant 0 : i32
    return %c0_i32, %c0_i32_0 : i32, i32
  }
  func.func @transform_4(%arg0: i32) -> (i32, i32) {
    %c0_i32 = arith.constant 0 : i32
    %c0_i32_0 = arith.constant 0 : i32
    %c0_i32_1 = arith.constant 0 : i32
    return %c0_i32, %c0_i32_0 : i32, i32
  }
  func.func @transform_5(%arg0: i32) -> (i32, i32) {
    %c0_i32 = arith.constant 0 : i32
    %c0_i32_0 = arith.constant 0 : i32
    %c0_i32_1 = arith.constant 0 : i32
    return %c0_i32, %c0_i32_0 : i32, i32
  }
  func.func @transform_6(%arg0: i32) -> (i32, i32, i32) {
    %c0_i32 = arith.constant 0 : i32
    %c0_i32_0 = arith.constant 0 : i32
    %c0_i32_1 = arith.constant 0 : i32
    %c0_i32_2 = arith.constant 0 : i32
    return %c0_i32, %c0_i32_0, %c0_i32_1 : i32, i32, i32
  }
  func.func @transform_7(%arg0: i32) -> (i32, i32) {
    %c0_i32 = arith.constant 0 : i32
    %c0_i32_0 = arith.constant 0 : i32
    %c0_i32_1 = arith.constant 0 : i32
    return %c0_i32, %c0_i32_0 : i32, i32
  }
  func.func @transform_8(%arg0: i32) -> (i32, i32) {
    %c0_i32 = arith.constant 0 : i32
    %c0_i32_0 = arith.constant 0 : i32
    %c0_i32_1 = arith.constant 0 : i32
    return %c0_i32, %c0_i32_0 : i32, i32
  }
  func.func @transform_9(%arg0: i32) -> (i32, i32) {
    %c0_i32 = arith.constant 0 : i32
    %c0_i32_0 = arith.constant 0 : i32
    %c0_i32_1 = arith.constant 0 : i32
    return %c0_i32, %c0_i32_0 : i32, i32
  }
  func.func @transform_10(%arg0: i32) -> (i32, i32) {
    %c0_i32 = arith.constant 0 : i32
    %c0_i32_0 = arith.constant 0 : i32
    %c0_i32_1 = arith.constant 0 : i32
    return %c0_i32, %c0_i32_0 : i32, i32
  }
  func.func @transform_11(%arg0: i32) -> (i32, i32) {
    %c0_i32 = arith.constant 0 : i32
    %c0_i32_0 = arith.constant 0 : i32
    %c0_i32_1 = arith.constant 0 : i32
    return %c0_i32, %c0_i32_0 : i32, i32
  }
  func.func @transform_12(%arg0: i32) -> (i32, i32) {
    %c0_i32 = arith.constant 0 : i32
    %c0_i32_0 = arith.constant 0 : i32
    %c0_i32_1 = arith.constant 0 : i32
    return %c0_i32, %c0_i32_0 : i32, i32
  }
  func.func @transform_13(%arg0: i32) -> (i32, i32) {
    %c0_i32 = arith.constant 0 : i32
    %c0_i32_0 = arith.constant 0 : i32
    %c0_i32_1 = arith.constant 0 : i32
    return %c0_i32, %c0_i32_0 : i32, i32
  }
  func.func @transform_14(%arg0: i32) -> (i32, i32, i32) {
    %c0_i32 = arith.constant 0 : i32
    %c0_i32_0 = arith.constant 0 : i32
    %c0_i32_1 = arith.constant 0 : i32
    return %arg0, %c0_i32, %c0_i32_0 : i32, i32, i32
  }
}

</mosaic_0001>

<bundles_post_ra>
// kernel: _lambda_.5
= control target key start
LH: loop header
LB: loop body
LE: loop exit
PB: predicated region body
PF: predicated region fallthrough
CT: control target
= control target key end

     0   :  { %vm23_vm0 = vcmask 261120   ;;  %s262_s0 = inlined_call_operand.vmem [shape: f32[2,8,32], index: 0, kind: input, shape index: {}]   ;;  %s263_s1 = inlined_call_operand.vmem [shape: f32[1,32], index: 1, kind: input, shape index: {}]   ;;  %s264_s2 = inlined_call_operand.vmem [shape: f32[1,32], index: 2, kind: input, shape index: {}]   ;;  %s265_s3 = inlined_call_operand.vmem [shape: bf16[32,256], index: 3, kind: input, shape index: {}]   ;;  %s266_s4 = inlined_call_operand.hbm [shape: f32[2,8,256], index: 4, kind: output, shape index: {}]  }
   0x1   :  { %v19_v0 = vld [vmem:[%s262_s0] sm:$0xff]  ;;  %v20_v1 = vld [vmem:[%s262_s0 + $0x8] sm:$0xff] }
   0x2   :  { %v24_v2 = vsel %vm23_vm0, %v19_v0, 0.0 }
   0x3   :  { %25 = vadd.xlane.f32.xlu0 %v24_v2 }
   0x4   :  { %9 = vsyncpa [#allocation3], 0  ;;  %v27_v3 = vsel %vm23_vm0, %v20_v1, 0.0  ;;  %v169_v14 = vld [vmem:[%s265_s3 + $0x14] ss:$8 sps:$4 sm:$0xff]   ;;  %v201_v17 = vmov 0  }
   0x5   :  { %v171_v15 = vld [vmem:[%s265_s3 + $0x10] ss:$8 sps:$4 sm:$0xff]   ;;  %v172_v16 = vld [vmem:[%s265_s3 + $0x4] ss:$8 sps:$4 sm:$0xff]   ;;  %107 = vmatprep.subr.bf16.mxu0 %v169_v14  ;;  %127 = vmatprep.mubr.bf16.mxu0 %v201_v17  ;;  %v174_v18 = vld [vmem:[%s265_s3] ss:$8 sps:$4 sm:$0xff]  }
   0x6   :  { %108 = vmatpush1.bf16.msra.mxu0 %v171_v15  ;;  %v158_v27 = vld [vmem:[%s263_s1] ss:$0 sm:$0xff]  ;;  %s202_s29 = smov [#allocation2]  }
   0x7   :  { %28 = vadd.xlane.f32.xlu0 %v27_v3  ;;  %109 = vmatprep.subr.bf16.mxu0 %v172_v16  ;;  %v159_v31 = vld [vmem:[%s264_s2] ss:$0 sm:$0xff]  ;;  %s147_s30 = sshll.u32 %s202_s29, 4  ;;  %s148_s30 = int_to_ptr.vmem [resolvable:$true] %s147_s30 }
   0x8   :  { %s179_s1 = scalar_lea.vmem %s148_s30, 512  ;;  %p184_p1 = scmp.lt.s32.totalorder %s148_s30, %s148_s30 }
   0x9   :  { %p180_p0 = scmp.ne.s32.totalorder %s148_s30, %s179_s1  ;;  %p185_p2 = scmp.lt.s32.totalorder %s179_s1, %s179_s1 }
   0xa   :  { %110 = vmatpush1.bf16.msra.mxu0 %v174_v18 }
   0xb   :  { %p186_p3 = por %p185_p2, %p184_p1 }
   0xd   :  { %p187_p4 = pnand %p186_p3, %p180_p0 }
  0x8c   :  { %v26_v4 = vpop.xlane.xlu0 %25 }
  0x8d   :  { %v31_v5 = vmul.f32 0.03125, %v26_v4 }
  0x8f   :  { %v33_v6 = vsub.f32 %v19_v0, %v31_v5 }
  0x90   :  { %v29_v7 = vpop.xlane.xlu0 %28 }
  0x91   :  { %v32_v8 = vmul.f32 0.03125, %v29_v7  ;;  %v35_v9 = vmul.f32 %v33_v6, %v33_v6 }
  0x93   :  { %v34_v10 = vsub.f32 %v20_v1, %v32_v8  ;;  %v37_v11 = vsel %vm23_vm0, %v35_v9, 0.0 }
  0x94   :  { %38 = vadd.xlane.f32.xlu1 %v37_v11 }
  0x95   :  { %v36_v12 = vmul.f32 %v34_v10, %v34_v10 }
  0x97   :  { %v40_v13 = vsel %vm23_vm0, %v36_v12, 0.0 }
  0x98   :  { %41 = vadd.xlane.f32.xlu1 %v40_v13 }
 0x11d   :  { %v39_v19 = vpop.xlane.xlu1 %38 }
 0x11e   :  { %v43_v20 = vmul.f32 0.03125, %v39_v19 }
 0x120   :  { %v45_v21 = vadd.f32 1e-05, %v43_v20 }
 0x121   :  { %v42_v22 = vpop.xlane.xlu1 %41 }
 0x122   :  { %175 = vrsqrt.f32 %v45_v21  ;;  %v44_v23 = vmul.f32 0.03125, %v42_v22 }
 0x124   :  { %v46_v24 = vadd.f32 1e-05, %v44_v23 }
 0x126   :  { %177 = vrsqrt.f32 %v46_v24 }
 0x12f   :  { %v176_v25 = vpop.eup %175 }
 0x130   :  { %v49_v26 = vmul.f32 %v176_v25, %v33_v6 }
 0x132   :  { %v57_v30 = vmul.f32 %v158_v27, %v49_v26 }
 0x133   :  { %v178_v28 = vpop.eup %177 }
 0x134   :  { %v50_v29 = vmul.f32 %v178_v28, %v34_v10  ;;  %v65_v33 = vadd.f32 %v159_v31, %v57_v30 }
 0x136   :  { %v58_v32 = vmul.f32 %v158_v27, %v50_v29 }
 0x138   :  { %v66_v34 = vadd.f32 %v159_v31, %v58_v32 }
 0x13a   :  { %v67_v35 = vpack.c.bf16 %v66_v34, %v65_v33 }
 0x13c   :  { %164 = vmatmul.mubr.msk.bf16.vlgmr.msra.gmra.mxu0 %vm23_vm0, %v67_v35 }
 0x1fc   :  { %v129_v36 = vpop.f32.mrf.mxu0 }
 0x1fd   :  { %138 = vst [vmem:[#allocation2] sm:$0xff] %v129_v36 }
 0x1fe   :  { %v131_v37 = vpop.f32.mrf.mxu0 }
 0x1ff   :  { %139 = vst [vmem:[#allocation2 + $0x8] sm:$0xff] %v131_v37 }
 0x200   :  { %v133_v38 = vpop.f32.mrf.mxu0 }
 0x201   :  { %140 = vst [vmem:[#allocation2 + $0x10] sm:$0xff] %v133_v38 }
 0x202   :  { %v135_v39 = vpop.f32.mrf.mxu0 }
 0x203   :  { %141 = vst [vmem:[#allocation2 + $0x18] sm:$0xff] %v135_v39 }
 0x204   :  { %190 = shalt.err (!%p187_p4)
}
 0x205   :  { %s203_s2 = smov 256   ;;  %s204_s5 = smov 16  }
 0x206   :  { %153 = dma.vmem_to_hbm [thread:$0]  %s148_s30, 512, %s266_s4, [#allocation3], %s203_s2, %s203_s2, %s204_s5  }
 0x207   :  { %199 = dma.done.wait [#allocation3], 512  }
 0x208   :  { %200 = vsyncadd [#allocation3], 4294966784 }
 0x209   :  { %157 = vsyncpa [#allocation3], 1 }

// kernel: _lambda_.3
= control target key start
LH: loop header
LB: loop body
LE: loop exit
PB: predicated region body
PF: predicated region fallthrough
CT: control target
= control target key end

     0   :  { %vm52_vm0 = vcmask 261120   ;;  %v1981_v14 = vmov 0.0   ;;  %vm1982_vm1 = vmmov 0   ;;  %vm282_vm2 = vcmask 64512   ;;  %s2428_s0 = inlined_call_operand.vmem [shape: f32[2,8,32], index: 0, kind: input, shape index: {}]   ;;  %s2429_s3 = inlined_call_operand.vmem [shape: bf16[32,32], index: 3, kind: input, shape index: {}]   ;;  %s2430_s4 = inlined_call_operand.vmem [shape: bf16[32,32], index: 4, kind: input, shape index: {}]   ;;  %s2431_s5 = inlined_call_operand.vmem [shape: bf16[32,32], index: 5, kind: input, shape index: {}]   ;;  %s2432_s1 = inlined_call_operand.vmem [shape: f32[1,32], index: 1, kind: input, shape index: {}]   ;;  %s2433_s2 = inlined_call_operand.vmem [shape: f32[1,32], index: 2, kind: input, shape index: {}]   ;;  %s2434_s6 = inlined_call_operand.vmem [shape: bf16[4,8,32], index: 6, kind: input, shape index: {}]   ;;  %s2435_s7 = inlined_call_operand.vmem [shape: f32[1,32], index: 7, kind: input, shape index: {}]   ;;  %s2436_s10 = inlined_call_operand.vmem [shape: bf16[32,128], index: 10, kind: input, shape index: {}]   ;;  %s2437_s8 = inlined_call_operand.vmem [shape: f32[1,32], index: 8, kind: input, shape index: {}]   ;;  %s2438_s9 = inlined_call_operand.vmem [shape: f32[1,32], index: 9, kind: input, shape index: {}]   ;;  %s2439_s12 = inlined_call_operand.vmem [shape: bf16[128,32], index: 12, kind: input, shape index: {}]   ;;  %s2440_s11 = inlined_call_operand.vmem [shape: f32[1,128], index: 11, kind: input, shape index: {}]   ;;  %s2441_s13 = inlined_call_operand.vmem [shape: f32[1,32], index: 13, kind: input, shape index: {}]   ;;  %s2442_s14 = inlined_call_operand.vmem [shape: f32[2,8,32], index: 14, kind: output, shape index: {}]  }
   0x1   :  { %v2064_v0 = vld [vmem:[%s2428_s0] sm:$0xff]  ;;  %v2069_v1 = vld [vmem:[%s2428_s0 + $0x8] sm:$0xff]  ;;  %1744 = vmatprep.subr.bf16.mxu1 %v1981_v14  ;;  %1748 = vmatprep.mubr.msk.bf16.mxu1 %vm1982_vm1, %v1981_v14  ;;  %vm406_vm3 = vcmask 1043456   ;;  %v271_v60 = vlaneseq  ;;  %s1985_s0 = smov 104  }
   0x2   :  { %v53_v2 = vsel %vm52_vm0, %v2064_v0, 0.0  ;;  %v56_v3 = vsel %vm52_vm0, %v2069_v1, 0.0  ;;  %v1921_v15 = vld [vmem:[%s2429_s3 + $0x8] sm:$0xff]   ;;  %1774 = vmatprep.subr.bf16.mxu0 %v1981_v14  ;;  %1776 = vmatprep.mubr.msk.bf16.mxu0 %vm1982_vm1, %v1981_v14  ;;  %v1922_v16 = vld [vmem:[%s2429_s3] sm:$0xff]  }
   0x3   :  { %54 = vadd.xlane.f32.xlu0 %v53_v2  ;;  %1745 = vmatpush3.bf16.msra.mxu1 %v1921_v15  ;;  %v1633_v25 = vld [vmem:[%s2432_s1] ss:$0 sm:$0xff]  ;;  %v1923_v33 = vld [vmem:[%s2430_s4 + $0x8] sm:$0xff]   ;;  %v272_v61 = vshrl.u32 %v271_v60, 7  ;;  %v274_v62 = vand.u32 127, %v271_v60 }
   0x4   :  { %1746 = vmatprep.subr.bf16.mxu1 %v1981_v14  ;;  %v1634_v29 = vld [vmem:[%s2433_s2] ss:$0 sm:$0xff]  ;;  %v1925_v36 = vld [vmem:[%s2431_s5 + $0x8] sm:$0xff]  }
   0x5   :  { %v1924_v35 = vld [vmem:[%s2430_s4] sm:$0xff]   ;;  %vm2156_vm4 = vcmp.ge.s32.totalorder %v272_v61, %v274_v62  ;;  %s1983_s4 = smov 120  }
   0x6   :  { %v1926_v37 = vld [vmem:[%s2431_s5] sm:$0xff]   ;;  %s1984_s5 = smov 112  }
   0x7   :  { %57 = vadd.xlane.f32.xlu0 %v56_v3  ;;  %1747 = vmatpush3.bf16.msra.mxu1 %v1922_v16 }
   0x8   :  { %1752 = vmatprep.subr.bf16.mxu1 %v1981_v14 }
  0x8c   :  { %v55_v4 = vpop.xlane.xlu0 %54 }
  0x8d   :  { %v60_v5 = vmul.f32 0.03125, %v55_v4 }
  0x8f   :  { %v62_v6 = vsub.f32 %v2064_v0, %v60_v5 }
  0x90   :  { %v58_v7 = vpop.xlane.xlu0 %57 }
  0x91   :  { %v61_v8 = vmul.f32 0.03125, %v58_v7  ;;  %v64_v9 = vmul.f32 %v62_v6, %v62_v6 }
  0x93   :  { %v63_v10 = vsub.f32 %v2069_v1, %v61_v8  ;;  %v66_v11 = vsel %vm52_vm0, %v64_v9, 0.0 }
  0x94   :  { %67 = vadd.xlane.f32.xlu1 %v66_v11 }
  0x95   :  { %v65_v12 = vmul.f32 %v63_v10, %v63_v10 }
  0x97   :  { %v69_v13 = vsel %vm52_vm0, %v65_v12, 0.0 }
  0x98   :  { %70 = vadd.xlane.f32.xlu1 %v69_v13 }
 0x11d   :  { %v68_v17 = vpop.xlane.xlu1 %67 }
 0x11e   :  { %v72_v18 = vmul.f32 0.03125, %v68_v17 }
 0x120   :  { %v74_v19 = vadd.f32 1e-05, %v72_v18 }
 0x121   :  { %v71_v20 = vpop.xlane.xlu1 %70 }
 0x122   :  { %1937 = vrsqrt.f32 %v74_v19  ;;  %v73_v21 = vmul.f32 0.03125, %v71_v20 }
 0x124   :  { %v75_v22 = vadd.f32 1e-05, %v73_v21 }
 0x126   :  { %1939 = vrsqrt.f32 %v75_v22 }
 0x12f   :  { %v1938_v23 = vpop.eup %1937 }
 0x130   :  { %v78_v24 = vmul.f32 %v1938_v23, %v62_v6 }
 0x132   :  { %v86_v28 = vmul.f32 %v1633_v25, %v78_v24 }
 0x133   :  { %v1940_v26 = vpop.eup %1939 }
 0x134   :  { %v79_v27 = vmul.f32 %v1940_v26, %v63_v10  ;;  %v94_v31 = vadd.f32 %v1634_v29, %v86_v28 }
 0x136   :  { %v87_v30 = vmul.f32 %v1633_v25, %v79_v27 }
 0x138   :  { %v95_v32 = vadd.f32 %v1634_v29, %v87_v30 }
 0x13a   :  { %v96_v34 = vpack.c.bf16 %v95_v32, %v94_v31 }
 0x13c   :  { %1749 = vmatmul.mubr.msk.bf16.vlgmr.msra.gmra.mxu1 %vm52_vm0, %v96_v34 }
 0x13d   :  { %1753 = vmatpush3.bf16.msra.mxu1 %v1923_v33  ;;  %1756 = vmatprep.mubr.msk.bf16.mxu1 %vm1982_vm1, %v1981_v14 }
 0x13e   :  { %1754 = vmatprep.subr.bf16.mxu1 %v1981_v14 }
 0x141   :  { %1755 = vmatpush3.bf16.msra.mxu1 %v1924_v35 }
 0x142   :  { %1760 = vmatprep.subr.bf16.mxu1 %v1981_v14 }
 0x144   :  { %1757 = vmatmul.mubr.msk.bf16.vlgmr.msra.gmra.mxu1 %vm52_vm0, %v96_v34 }
 0x145   :  { %1761 = vmatpush3.bf16.msra.mxu1 %v1925_v36  ;;  %1764 = vmatprep.mubr.msk.bf16.mxu1 %vm1982_vm1, %v1981_v14 }
 0x146   :  { %1762 = vmatprep.subr.bf16.mxu1 %v1981_v14 }
 0x149   :  { %1763 = vmatpush3.bf16.msra.mxu1 %v1926_v37 }
 0x14a   :  { %1768 = vmatprep.subr.bf16.mxu1 %v1981_v14 }
 0x14c   :  { %1765 = vmatmul.mubr.msk.bf16.vlgmr.msra.gmra.mxu1 %vm52_vm0, %v96_v34 }
 0x14d   :  { %1770 = vmatprep.mubr.msk.bf16.mxu1 %vm1982_vm1, %v1981_v14 }
 0x1fc   :  { %v150_v38 = vpop.f32.mrf.mxu1 }
 0x1fd   :  { %v2133_v51 = vpack.c.bf16 %v150_v38, %v150_v38 }
 0x1fe   :  { %v1750_v39 = vpop.f32.mrf.mxu1 }
 0x200   :  { %v153_v40 = vpop.f32.mrf.mxu1 }
 0x201   :  { %v2144_v56 = vpack.c.bf16 %v153_v40, %v153_v40 }
 0x202   :  { %v1751_v41 = vpop.f32.mrf.mxu1 }
 0x204   :  { %v207_v42 = vpop.f32.mrf.mxu1 }
 0x205   :  { %v2124_v43 = vpack.c.bf16 %v207_v42, %v207_v42 }
 0x206   :  { %v1758_v44 = vpop.f32.mrf.mxu1 }
 0x207   :  { %v287_v45 = vsel %vm282_vm2, %v2124_v43, 0 }
 0x208   :  { %v210_v46 = vpop.f32.mrf.mxu1  ;;  %1769 = vmatpush3.bf16.xpose.msra.mxu1 %v287_v45 }
 0x209   :  { %v2128_v47 = vpack.c.bf16 %v210_v46, %v210_v46  ;;  %1780 = vmatprep.subr.bf16.mxu1 %v1981_v14 }
 0x20a   :  { %v1759_v48 = vpop.f32.mrf.mxu1 }
 0x20b   :  { %v333_v49 = vsel %vm282_vm2, %v2128_v47, 0 }
 0x20c   :  { %v264_v50 = vpop.f32.mrf.mxu1  ;;  %1775 = vmatpush3.bf16.xpose.msra.mxu0 %v333_v49 }
 0x20d   :  { %v2135_v52 = vpack.c.bf16 %v264_v50, %v264_v50  ;;  %1786 = vmatprep.subr.bf16.mxu0 %v1981_v14 }
 0x20e   :  { %v1766_v53 = vpop.f32.mrf.mxu1 }
 0x20f   :  { %1771 = vmatmul.mubr.msk.bf16.vlgmr.msra.gmra.mxu1 %vm282_vm2, %v2133_v51  ;;  %v408_v54 = vsel %vm406_vm3, %v2135_v52, 0 }
 0x210   :  { %v267_v55 = vpop.f32.mrf.mxu1  ;;  %1781 = vmatpush3.bf16.msra.mxu1 %v408_v54  ;;  %1782 = vmatprep.mubr.msk.bf16.mxu1 %vm1982_vm1, %v1981_v14 }
 0x211   :  { %v2146_v57 = vpack.c.bf16 %v267_v55, %v267_v55  ;;  %1792 = vmatprep.subr.bf16.mxu1 %v1981_v14 }
 0x212   :  { %v1767_v58 = vpop.f32.mrf.mxu1 }
 0x213   :  { %1777 = vmatmul.mubr.msk.bf16.vlgmr.msra.gmra.mxu0 %vm282_vm2, %v2144_v56  ;;  %v454_v59 = vsel %vm406_vm3, %v2146_v57, 0 }
 0x214   :  { %1787 = vmatpush3.bf16.msra.mxu0 %v454_v59  ;;  %1788 = vmatprep.mubr.msk.bf16.mxu0 %vm1982_vm1, %v1981_v14 }
 0x215   :  { %1798 = vmatprep.subr.bf16.mxu0 %v1981_v14 }
 0x2cf   :  { %v323_v2 = vpop.f32.mrf.mxu1 }
 0x2d0   :  { %v377_v3 = vsel %vm2156_vm4, %v323_v2, -1e+30 }
 0x2d1   :  { %v1772_v4 = vpop.f32.mrf.mxu1  ;;  %v379_v5 = vsel %vm282_vm2, %v377_v3, -inf }
 0x2d2   :  { %380 = vmax.xlane.f32.xlu0 %v379_v5 }
 0x2d3   :  { %v326_v6 = vpop.f32.mrf.mxu1  ;;  %v369_v7 = vpop.f32.mrf.mxu0 }
 0x2d4   :  { %v378_v8 = vsel %vm2156_vm4, %v369_v7, -1e+30 }
 0x2d5   :  { %v1773_v9 = vpop.f32.mrf.mxu1  ;;  %v1778_v10 = vpop.f32.mrf.mxu0  ;;  %v382_v11 = vsel %vm282_vm2, %v378_v8, -inf }
 0x2d6   :  { %383 = vmax.xlane.f32.xlu1 %v382_v11 }
 0x2d7   :  { %v372_v12 = vpop.f32.mrf.mxu0 }
 0x2d9   :  { %v1779_v13 = vpop.f32.mrf.mxu0 }
 0x2e7   :  { %554 = vrot.lane.b32.xlu1 %v2128_v47, %s1983_s4 }
 0x35b   :  { %v381_v15 = vpop.xlane.xlu0 %380 }
 0x35c   :  { %v385_v16 = vsub.f32 %v377_v3, %v381_v15 }
 0x35e   :  { %v387_v17 = vmul.f32 1.442695, %v385_v16 }
 0x35f   :  { %v384_v18 = vpop.xlane.xlu1 %383 }
 0x360   :  { %1941 = vpow2.f32 %v387_v17  ;;  %v386_v19 = vsub.f32 %v378_v8, %v384_v18 }
 0x362   :  { %v389_v20 = vmul.f32 1.442695, %v386_v19 }
 0x363   :  { %v555_v25 = vpop.permute.xlu1 %554 }
 0x364   :  { %1943 = vpow2.f32 %v389_v20  ;;  %v560_v36 = vsel %vm282_vm2, %v555_v25, 0 }
 0x36d   :  { %v1942_v21 = vpop.eup %1941 }
 0x36e   :  { %v391_v22 = vsel %vm282_vm2, %v1942_v21, 0.0 }
 0x36f   :  { %392 = vadd.xlane.f32.xlu0 %v391_v22 }
 0x371   :  { %v1944_v23 = vpop.eup %1943 }
 0x372   :  { %v394_v24 = vsel %vm282_vm2, %v1944_v23, 0.0 }
 0x373   :  { %395 = vadd.xlane.f32.xlu1 %v394_v24 }
 0x384   :  { %499 = vrot.lane.b32.xlu1 %v2133_v51, %s1983_s4 }
 0x385   :  { %502 = vrot.lane.b32.xlu0 %v2124_v43, %s1983_s4 }
 0x388   :  { %551 = vrot.lane.b32.xlu1 %v2144_v56, %s1983_s4 }
 0x3f8   :  { %v393_v26 = vpop.xlane.xlu0 %392 }
 0x3f9   :  { %1945 = vrcp.f32 %v393_v26  ;;  %v497_v26 = vld [vmem:[%s2434_s6] sm:$0xf] }
 0x3fc   :  { %v396_v27 = vpop.xlane.xlu1 %395  ;;  %v503_v30 = vpop.permute.xlu0 %502 }
 0x3fd   :  { %1947 = vrcp.f32 %v396_v27  ;;  %v508_v33 = vsel %vm282_vm2, %v503_v30, 0 }
 0x400   :  { %v500_v37 = vpop.permute.xlu1 %499 }
 0x404   :  { %v552_v38 = vpop.permute.xlu1 %551 }
 0x406   :  { %v1946_v28 = vpop.eup %1945 }
 0x407   :  { %v399_v29 = vmul.f32 %v1946_v28, %v1942_v21 }
 0x409   :  { %v401_v31 = vpack.c.bf16 %v399_v29, %v399_v29  ;;  %v780_v29 = vsel %vm406_vm3, %v497_v26, 0 }
 0x40a   :  { %v1948_v32 = vpop.eup %1947 }
 0x40b   :  { %1783 = vmatmul.mubr.msk.bf16.vlgmr.msra.gmra.mxu1 %vm282_vm2, %v401_v31  ;;  %v400_v34 = vmul.f32 %v1948_v32, %v1944_v23 }
 0x40c   :  { %1793 = vmatpush3.bf16.xpose.msra.mxu1 %v508_v33  ;;  %1794 = vmatprep.mubr.msk.bf16.mxu1 %vm1982_vm1, %v1981_v14 }
 0x40d   :  { %v402_v35 = vpack.c.bf16 %v400_v34, %v400_v34  ;;  %1804 = vmatprep.subr.bf16.mxu1 %v1981_v14  ;;  %v1652_v34 = vld [vmem:[%s2434_s6 + $0x4] sm:$0xf] }
 0x40f   :  { %1789 = vmatmul.mubr.msk.bf16.vlgmr.msra.gmra.mxu0 %vm282_vm2, %v402_v35  ;;  %v733_v35 = vsel %vm406_vm3, %v1652_v34, 0 }
 0x410   :  { %1799 = vmatpush3.bf16.xpose.msra.mxu0 %v560_v36  ;;  %1800 = vmatprep.mubr.msk.bf16.mxu0 %vm1982_vm1, %v1981_v14 }
 0x411   :  { %1810 = vmatprep.subr.bf16.mxu0 %v1981_v14 }
 0x413   :  { %1795 = vmatmul.mubr.msk.bf16.vlgmr.msra.gmra.mxu1 %vm282_vm2, %v500_v37 }
 0x414   :  { %1806 = vmatprep.mubr.msk.bf16.mxu1 %vm1982_vm1, %v1981_v14 }
 0x417   :  { %1801 = vmatmul.mubr.msk.bf16.vlgmr.msra.gmra.mxu0 %vm282_vm2, %v552_v38 }
 0x418   :  { %1812 = vmatprep.mubr.msk.bf16.mxu0 %vm1982_vm1, %v1981_v14 }
 0x4cb   :  { %v2192_v39 = vpop.f32.mrf.mxu1 }
 0x4cd   :  { %v1784_v40 = vpop.f32.mrf.mxu1 }
 0x4cf   :  { %v447_v41 = vpop.f32.mrf.mxu1  ;;  %v2194_v42 = vpop.f32.mrf.mxu0 }
 0x4d0   :  { %v496_v44 = vpack.c.bf16 %v2194_v42, %v2192_v39 }
 0x4d1   :  { %v1785_v45 = vpop.f32.mrf.mxu1  ;;  %v1790_v46 = vpop.f32.mrf.mxu0 }
 0x4d3   :  { %v493_v48 = vpop.f32.mrf.mxu0  ;;  %v544_v49 = vpop.f32.mrf.mxu1 }
 0x4d4   :  { %v602_v50 = vsel %vm2156_vm4, %v544_v49, -1e+30 }
 0x4d5   :  { %v1791_v53 = vpop.f32.mrf.mxu0  ;;  %v1796_v54 = vpop.f32.mrf.mxu1  ;;  %v604_v55 = vsel %vm282_vm2, %v602_v50, -inf }
 0x4d6   :  { %605 = vmax.xlane.f32.xlu0 %v604_v55 }
 0x4d7   :  { %v547_v58 = vpop.f32.mrf.mxu1  ;;  %v596_v59 = vpop.f32.mrf.mxu0 }
 0x4d8   :  { %v603_v60 = vsel %vm2156_vm4, %v596_v59, -1e+30 }
 0x4d9   :  { %v1797_v61 = vpop.f32.mrf.mxu1  ;;  %v1802_v62 = vpop.f32.mrf.mxu0  ;;  %v607_v2 = vsel %vm282_vm2, %v603_v60, -inf }
 0x4da   :  { %608 = vmax.xlane.f32.xlu1 %v607_v2 }
 0x4db   :  { %v599_v3 = vpop.f32.mrf.mxu0 }
 0x4dd   :  { %v1803_v4 = vpop.f32.mrf.mxu0 }
 0x4eb   :  { %678 = vrot.lane.b32.xlu1 %v2146_v57, %s1983_s4 }
 0x4ef   :  { %825 = vrot.lane.b32.xlu1 %v2124_v43, %s1984_s5 }
 0x4f3   :  { %875 = vrot.lane.b32.xlu1 %v2128_v47, %s1984_s5 }
 0x4f7   :  { %873 = vrot.lane.b32.xlu1 %v2144_v56, %s1984_s5 }
 0x55f   :  { %v606_v5 = vpop.xlane.xlu0 %605 }
 0x560   :  { %v610_v6 = vsub.f32 %v602_v50, %v606_v5 }
 0x562   :  { %v612_v7 = vmul.f32 1.442695, %v610_v6 }
 0x563   :  { %v609_v8 = vpop.xlane.xlu1 %608 }
 0x564   :  { %1949 = vpow2.f32 %v612_v7  ;;  %v611_v9 = vsub.f32 %v603_v60, %v609_v8 }
 0x566   :  { %v614_v10 = vmul.f32 1.442695, %v611_v9 }
 0x567   :  { %v679_v11 = vpop.permute.xlu1 %678 }
 0x568   :  { %1951 = vpow2.f32 %v614_v10  ;;  %v684_v12 = vsel %vm406_vm3, %v679_v11, 0 }
 0x569   :  { %1811 = vmatpush3.bf16.msra.mxu0 %v684_v12 }
 0x56a   :  { %1822 = vmatprep.subr.bf16.mxu0 %v1981_v14 }
 0x56b   :  { %v826_v30 = vpop.permute.xlu1 %825 }
 0x56f   :  { %v876_v31 = vpop.permute.xlu1 %875 }
 0x570   :  { %v881_v32 = vsel %vm282_vm2, %v876_v31, 0 }
 0x571   :  { %v1950_v13 = vpop.eup %1949 }
 0x572   :  { %v616_v15 = vsel %vm282_vm2, %v1950_v13, 0.0 }
 0x573   :  { %617 = vadd.xlane.f32.xlu0 %v616_v15  ;;  %v874_v33 = vpop.permute.xlu1 %873 }
 0x575   :  { %v1952_v16 = vpop.eup %1951 }
 0x576   :  { %v619_v17 = vsel %vm282_vm2, %v1952_v16, 0.0 }
 0x577   :  { %620 = vadd.xlane.f32.xlu0 %v619_v17 }
 0x58d   :  { %629 = vrot.lane.b32.xlu0 %v2135_v52, %s1983_s4 }
 0x591   :  { %823 = vrot.lane.b32.xlu0 %v2133_v51, %s1984_s5 }
 0x5fc   :  { %v618_v18 = vpop.xlane.xlu0 %617 }
 0x5fd   :  { %1953 = vrcp.f32 %v618_v18 }
 0x600   :  { %v621_v19 = vpop.xlane.xlu0 %620 }
 0x601   :  { %1955 = vrcp.f32 %v621_v19 }
 0x604   :  { %v630_v20 = vpop.permute.xlu0 %629 }
 0x605   :  { %v635_v21 = vsel %vm406_vm3, %v630_v20, 0 }
 0x606   :  { %1805 = vmatpush3.bf16.msra.mxu1 %v635_v21 }
 0x607   :  { %1816 = vmatprep.subr.bf16.mxu1 %v1981_v14 }
 0x608   :  { %v824_v49 = vpop.permute.xlu0 %823 }
 0x60a   :  { %v1954_v22 = vpop.eup %1953 }
 0x60b   :  { %v624_v23 = vmul.f32 %v1954_v22, %v1950_v13 }
 0x60d   :  { %v626_v24 = vpack.c.bf16 %v624_v23, %v624_v23 }
 0x60e   :  { %v1956_v25 = vpop.eup %1955 }
 0x60f   :  { %1807 = vmatmul.mubr.msk.bf16.vlgmr.msra.gmra.mxu1 %vm282_vm2, %v626_v24  ;;  %v625_v27 = vmul.f32 %v1956_v25, %v1952_v16 }
 0x610   :  { %1818 = vmatprep.mubr.msk.bf16.mxu1 %vm1982_vm1, %v1981_v14  ;;  %1817 = vmatpush3.bf16.msra.mxu1 %v733_v35 }
 0x611   :  { %v627_v28 = vpack.c.bf16 %v625_v27, %v625_v27  ;;  %1828 = vmatprep.subr.bf16.mxu1 %v1981_v14 }
 0x613   :  { %1813 = vmatmul.mubr.msk.bf16.vlgmr.msra.gmra.mxu0 %vm282_vm2, %v627_v28 }
 0x614   :  { %1823 = vmatpush3.bf16.msra.mxu0 %v780_v29  ;;  %1824 = vmatprep.mubr.msk.bf16.mxu0 %vm1982_vm1, %v1981_v14 }
 0x615   :  { %1834 = vmatprep.subr.bf16.mxu0 %v1981_v14 }
 0x61b   :  { %1825 = vmatmul.mubr.msk.bf16.vlgmr.msra.gmra.mxu0 %vm282_vm2, %v496_v44  ;;  %v831_v44 = vsel %vm282_vm2, %v826_v30, 0 }
 0x61c   :  { %1835 = vmatpush3.bf16.xpose.msra.mxu0 %v881_v32  ;;  %1836 = vmatprep.mubr.msk.bf16.mxu0 %vm1982_vm1, %v1981_v14 }
 0x61d   :  { %1846 = vmatprep.subr.bf16.mxu0 %v1981_v14 }
 0x623   :  { %1837 = vmatmul.mubr.msk.bf16.vlgmr.msra.gmra.mxu0 %vm282_vm2, %v874_v33 }
 0x624   :  { %1848 = vmatprep.mubr.msk.bf16.mxu0 %vm1982_vm1, %v1981_v14 }
 0x6cf   :  { %v671_v36 = vpop.f32.mrf.mxu1 }
 0x6d1   :  { %v1808_v37 = vpop.f32.mrf.mxu1 }
 0x6d3   :  { %v674_v38 = vpop.f32.mrf.mxu1  ;;  %v720_v39 = vpop.f32.mrf.mxu0 }
 0x6d4   :  { %v726_v40 = vpack.c.bf16 %v720_v39, %v671_v36  ;;  %v1659_v38 = vld [vmem:[%s2434_s6 + $0x8] sm:$0xf] }
 0x6d5   :  { %v1809_v41 = vpop.f32.mrf.mxu1  ;;  %v1814_v42 = vpop.f32.mrf.mxu0  ;;  %v1052_v39 = vsel %vm406_vm3, %v1659_v38, 0 }
 0x6d6   :  { %1819 = vmatmul.mubr.msk.bf16.vlgmr.msra.gmra.mxu1 %vm282_vm2, %v726_v40 }
 0x6d7   :  { %1829 = vmatpush3.bf16.xpose.msra.mxu1 %v831_v44  ;;  %v723_v45 = vpop.f32.mrf.mxu0  ;;  %1830 = vmatprep.mubr.msk.bf16.mxu1 %vm1982_vm1, %v1981_v14 }
 0x6d8   :  { %1840 = vmatprep.subr.bf16.mxu1 %v1981_v14 }
 0x6d9   :  { %v1815_v46 = vpop.f32.mrf.mxu0 }
 0x6db   :  { %v2254_v48 = vpop.f32.mrf.mxu0 }
 0x6dd   :  { %v1826_v50 = vpop.f32.mrf.mxu0 }
 0x6de   :  { %1831 = vmatmul.mubr.msk.bf16.vlgmr.msra.gmra.mxu1 %vm282_vm2, %v824_v49 }
 0x6df   :  { %v2257_v53 = vpop.f32.mrf.mxu0  ;;  %1842 = vmatprep.mubr.msk.bf16.mxu1 %vm1982_vm1, %v1981_v14 }
 0x6e1   :  { %v1827_v54 = vpop.f32.mrf.mxu0 }
 0x6e3   :  { %v917_v55 = vpop.f32.mrf.mxu0 }
 0x6e4   :  { %v924_v58 = vsel %vm2156_vm4, %v917_v55, -1e+30 }
 0x6e5   :  { %v1838_v59 = vpop.f32.mrf.mxu0  ;;  %v928_v60 = vsel %vm282_vm2, %v924_v58, -inf }
 0x6e6   :  { %929 = vmax.xlane.f32.xlu1 %v928_v60 }
 0x6e7   :  { %v920_v61 = vpop.f32.mrf.mxu0 }
 0x6e9   :  { %v1839_v62 = vpop.f32.mrf.mxu0 }
 0x6f7   :  { %997 = vrot.lane.b32.xlu1 %v2146_v57, %s1984_s5 }
 0x6fb   :  { %1099 = vrot.lane.b32.xlu1 %v2124_v43, %s1985_s0 }
 0x6ff   :  { %1149 = vrot.lane.b32.xlu1 %v2128_v47, %s1985_s0 }
 0x703   :  { %1147 = vrot.lane.b32.xlu1 %v2144_v56, %s1985_s0 }
 0x76f   :  { %v930_v2 = vpop.xlane.xlu1 %929 }
 0x770   :  { %v932_v5 = vsub.f32 %v924_v58, %v930_v2 }
 0x772   :  { %v935_v6 = vmul.f32 1.442695, %v932_v5 }
 0x773   :  { %v998_v3 = vpop.permute.xlu1 %997 }
 0x774   :  { %v1003_v4 = vsel %vm406_vm3, %v998_v3, 0  ;;  %1957 = vpow2.f32 %v935_v6 }
 0x775   :  { %1847 = vmatpush3.bf16.msra.mxu0 %v1003_v4 }
 0x776   :  { %1858 = vmatprep.subr.bf16.mxu0 %v1981_v14 }
 0x777   :  { %v1100_v25 = vpop.permute.xlu1 %1099 }
 0x778   :  { %v1105_v27 = vsel %vm282_vm2, %v1100_v25, 0 }
 0x77b   :  { %v1150_v49 = vpop.permute.xlu1 %1149 }
 0x77c   :  { %v1155_v58 = vsel %vm282_vm2, %v1150_v49, 0 }
 0x77f   :  { %v1148_v61 = vpop.permute.xlu1 %1147 }
 0x781   :  { %v1958_v12 = vpop.eup %1957 }
 0x782   :  { %v940_v16 = vsel %vm282_vm2, %v1958_v12, 0.0 }
 0x796   :  { %v2274_v7 = vpop.f32.mrf.mxu1 }
 0x797   :  { %v817_v6 = vadd.f32 %v2254_v48, %v2274_v7 }
 0x798   :  { %v1820_v8 = vpop.f32.mrf.mxu1 }
 0x79a   :  { %v2276_v43 = vpop.f32.mrf.mxu1 }
 0x79c   :  { %v1821_v9 = vpop.f32.mrf.mxu1 }
 0x79e   :  { %v867_v47 = vpop.f32.mrf.mxu1 }
 0x79f   :  { %v923_v56 = vsel %vm2156_vm4, %v867_v47, -1e+30 }
 0x7a0   :  { %v1832_v10 = vpop.f32.mrf.mxu1  ;;  %v925_v11 = vsel %vm282_vm2, %v923_v56, -inf }
 0x7a1   :  { %926 = vmax.xlane.f32.xlu0 %v925_v11 }
 0x7a2   :  { %v870_v13 = vpop.f32.mrf.mxu1 }
 0x7a4   :  { %v1833_v15 = vpop.f32.mrf.mxu1 }
 0x7a5   :  { %941 = vadd.xlane.f32.xlu0 %v940_v16 }
 0x82a   :  { %v927_v17 = vpop.xlane.xlu0 %926 }
 0x82b   :  { %v931_v18 = vsub.f32 %v923_v56, %v927_v17  ;;  %v820_v56 = vadd.f32 %v2257_v53, %v2276_v43 }
 0x82d   :  { %v933_v19 = vmul.f32 1.442695, %v931_v18 }
 0x82e   :  { %v942_v20 = vpop.xlane.xlu0 %941 }
 0x82f   :  { %1959 = vpow2.f32 %v933_v19 }
 0x830   :  { %1961 = vrcp.f32 %v942_v20 }
 0x83c   :  { %v1960_v21 = vpop.eup %1959 }
 0x83d   :  { %v1962_v22 = vpop.eup %1961  ;;  %v937_v23 = vsel %vm282_vm2, %v1960_v21, 0.0 }
 0x83e   :  { %938 = vadd.xlane.f32.xlu0 %v937_v23  ;;  %v946_v24 = vmul.f32 %v1962_v22, %v1958_v12 }
 0x840   :  { %v948_v26 = vpack.c.bf16 %v946_v24, %v946_v24 }
 0x842   :  { %1849 = vmatmul.mubr.msk.bf16.vlgmr.msra.gmra.mxu0 %vm282_vm2, %v948_v26 }
 0x843   :  { %1859 = vmatpush3.bf16.xpose.msra.mxu0 %v1105_v27  ;;  %1860 = vmatprep.mubr.msk.bf16.mxu0 %vm1982_vm1, %v1981_v14 }
 0x844   :  { %1870 = vmatprep.subr.bf16.mxu0 %v1981_v14 }
 0x854   :  { %949 = vrot.lane.b32.xlu0 %v2135_v52, %s1984_s5 }
 0x858   :  { %1097 = vrot.lane.b32.xlu0 %v2133_v51, %s1985_s0 }
 0x8c7   :  { %v939_v28 = vpop.xlane.xlu0 %938 }
 0x8c8   :  { %1963 = vrcp.f32 %v939_v28 }
 0x8cb   :  { %v950_v29 = vpop.permute.xlu0 %949 }
 0x8cc   :  { %v955_v30 = vsel %vm406_vm3, %v950_v29, 0 }
 0x8cd   :  { %1841 = vmatpush3.bf16.msra.mxu1 %v955_v30  ;;  %v1665_v30 = vld [vmem:[%s2434_s6 + $0xc] sm:$0xf] }
 0x8ce   :  { %1852 = vmatprep.subr.bf16.mxu1 %v1981_v14 }
 0x8cf   :  { %v1098_v31 = vpop.permute.xlu0 %1097 }
 0x8d0   :  { %1861 = vmatmul.mubr.msk.bf16.vlgmr.msra.gmra.mxu0 %vm282_vm2, %v1098_v31  ;;  %v1326_v31 = vsel %vm406_vm3, %v1665_v30, 0 }
 0x8d1   :  { %1872 = vmatprep.mubr.msk.bf16.mxu0 %vm1982_vm1, %v1981_v14 }
 0x8d5   :  { %v1964_v32 = vpop.eup %1963 }
 0x8d6   :  { %v945_v33 = vmul.f32 %v1964_v32, %v1960_v21 }
 0x8d8   :  { %v947_v34 = vpack.c.bf16 %v945_v33, %v945_v33 }
 0x8da   :  { %1843 = vmatmul.mubr.msk.bf16.vlgmr.msra.gmra.mxu1 %vm282_vm2, %v947_v34 }
 0x8db   :  { %1854 = vmatprep.mubr.msk.bf16.mxu1 %vm1982_vm1, %v1981_v14  ;;  %1853 = vmatpush3.bf16.msra.mxu1 %v1052_v39 }
 0x8dc   :  { %1864 = vmatprep.subr.bf16.mxu1 %v1981_v14 }
 0x902   :  { %v1039_v51 = vpop.f32.mrf.mxu0 }
 0x904   :  { %v1850_v35 = vpop.f32.mrf.mxu0 }
 0x906   :  { %v1042_v36 = vpop.f32.mrf.mxu0 }
 0x908   :  { %v1851_v37 = vpop.f32.mrf.mxu0 }
 0x990   :  { %v1141_v40 = vpop.f32.mrf.mxu0 }
 0x991   :  { %v1197_v41 = vsel %vm2156_vm4, %v1141_v40, -1e+30 }
 0x992   :  { %v1862_v42 = vpop.f32.mrf.mxu0  ;;  %v1199_v44 = vsel %vm282_vm2, %v1197_v41, -inf }
 0x993   :  { %1200 = vmax.xlane.f32.xlu0 %v1199_v44 }
 0x994   :  { %v1144_v45 = vpop.f32.mrf.mxu0 }
 0x996   :  { %v1863_v46 = vpop.f32.mrf.mxu0 }
 0x99a   :  { %v991_v50 = vpop.f32.mrf.mxu1 }
 0x99b   :  { %v1045_v54 = vpack.c.bf16 %v1039_v51, %v991_v50 }
 0x99c   :  { %v1844_v55 = vpop.f32.mrf.mxu1 }
 0x99d   :  { %1855 = vmatmul.mubr.msk.bf16.vlgmr.msra.gmra.mxu1 %vm282_vm2, %v1045_v54 }
 0x99e   :  { %1865 = vmatpush3.bf16.xpose.msra.mxu1 %v1155_v58  ;;  %v994_v59 = vpop.f32.mrf.mxu1  ;;  %1866 = vmatprep.mubr.msk.bf16.mxu1 %vm1982_vm1, %v1981_v14 }
 0x99f   :  { %1876 = vmatprep.subr.bf16.mxu1 %v1981_v14 }
 0x9a0   :  { %v1845_v60 = vpop.f32.mrf.mxu1 }
 0x9a5   :  { %1867 = vmatmul.mubr.msk.bf16.vlgmr.msra.gmra.mxu1 %vm282_vm2, %v1148_v61 }
 0x9a6   :  { %1878 = vmatprep.mubr.msk.bf16.mxu1 %vm1982_vm1, %v1981_v14 }
 0xa1c   :  { %v1201_v62 = vpop.xlane.xlu0 %1200 }
 0xa1d   :  { %v1205_v2 = vsub.f32 %v1197_v41, %v1201_v62  ;;  %v1667_v41 = vld [vmem:[%s2435_s7] ss:$0 sm:$0xff] }
 0xa1f   :  { %v1207_v3 = vmul.f32 1.442695, %v1205_v2 }
 0xa21   :  { %1965 = vpow2.f32 %v1207_v3 }
 0xa2e   :  { %v1966_v4 = vpop.eup %1965 }
 0xa2f   :  { %v1211_v5 = vsel %vm282_vm2, %v1966_v4, 0.0 }
 0xa30   :  { %1212 = vadd.xlane.f32.xlu0 %v1211_v5 }
 0xa5d   :  { %v1088_v8 = vpop.f32.mrf.mxu1 }
 0xa5e   :  { %v1095_v9 = vadd.f32 %v1088_v8, %v817_v6 }
 0xa5f   :  { %v1856_v47 = vpop.f32.mrf.mxu1 }
 0xa60   :  { %v1928_v47 = vld [vmem:[%s2436_s10] sm:$0xff]  }
 0xa61   :  { %v1091_v10 = vpop.f32.mrf.mxu1 }
 0xa62   :  { %v2321_v11 = vadd.f32 %v1091_v10, %v820_v56 }
 0xa63   :  { %v1857_v12 = vpop.f32.mrf.mxu1 }
 0xa65   :  { %v1191_v13 = vpop.f32.mrf.mxu1 }
 0xa66   :  { %v1198_v15 = vsel %vm2156_vm4, %v1191_v13, -1e+30 }
 0xa67   :  { %v1868_v16 = vpop.f32.mrf.mxu1  ;;  %v1202_v17 = vsel %vm282_vm2, %v1198_v15, -inf }
 0xa68   :  { %1203 = vmax.xlane.f32.xlu1 %v1202_v17 }
 0xa69   :  { %v1194_v18 = vpop.f32.mrf.mxu1 }
 0xa6a   :  { %v1668_v18 = vld [vmem:[%s2437_s8] ss:$0 sm:$0xff] }
 0xa6b   :  { %v1869_v48 = vpop.f32.mrf.mxu1 }
 0xa79   :  { %1271 = vrot.lane.b32.xlu1 %v2146_v57, %s1985_s0 }
 0xab9   :  { %v1213_v22 = vpop.xlane.xlu0 %1212 }
 0xaf1   :  { %v1204_v7 = vpop.xlane.xlu1 %1203 }
 0xaf2   :  { %v1206_v19 = vsub.f32 %v1198_v15, %v1204_v7 }
 0xaf4   :  { %v1209_v53 = vmul.f32 1.442695, %v1206_v19 }
 0xaf5   :  { %v1272_v43 = vpop.permute.xlu1 %1271 }
 0xaf6   :  { %1967 = vpow2.f32 %v1209_v53  ;;  %v1277_v20 = vsel %vm406_vm3, %v1272_v43, 0  ;;  %v1669_v53 = vld [vmem:[%s2438_s9] ss:$0 sm:$0xff] }
 0xaf7   :  { %1877 = vmatpush3.bf16.msra.mxu1 %v1277_v20  ;;  %1969 = vrcp.f32 %v1213_v22  ;;  %v1929_v22 = vld [vmem:[%s2439_s12 + $0x38] sm:$0xff]  }
 0xaf8   :  { %1888 = vmatprep.subr.bf16.mxu1 %v1981_v14 }
 0xb03   :  { %v1968_v63 = vpop.eup %1967 }
 0xb04   :  { %v1214_v21 = vsel %vm282_vm2, %v1968_v63, 0.0  ;;  %v1970_v57 = vpop.eup %1969 }
 0xb05   :  { %1215 = vadd.xlane.f32.xlu0 %v1214_v21  ;;  %v1219_v24 = vmul.f32 %v1970_v57, %v1966_v4  ;;  %v1930_v57 = vld [vmem:[%s2439_s12 + $0x30] sm:$0xff]  }
 0xb07   :  { %v1221_v27 = vpack.c.bf16 %v1219_v24, %v1219_v24  ;;  %v1932_v24 = vld [vmem:[%s2439_s12 + $0x20] sm:$0xff]  }
 0xb1b   :  { %1223 = vrot.lane.b32.xlu0 %v2135_v52, %s1985_s0 }
 0xb8e   :  { %v1216_v23 = vpop.xlane.xlu0 %1215 }
 0xb8f   :  { %1971 = vrcp.f32 %v1216_v23  ;;  %v1931_v23 = vld [vmem:[%s2439_s12 + $0x28] sm:$0xff]  }
 0xb92   :  { %v1224_v25 = vpop.permute.xlu0 %1223 }
 0xb93   :  { %v1229_v26 = vsel %vm406_vm3, %v1224_v25, 0  ;;  %v1933_v25 = vld [vmem:[%s2439_s12 + $0x18] sm:$0xff]  }
 0xb94   :  { %1871 = vmatpush3.bf16.msra.mxu0 %v1229_v26  ;;  %v1934_v26 = vld [vmem:[%s2439_s12 + $0x10] sm:$0xff]  }
 0xb95   :  { %1882 = vmatprep.subr.bf16.mxu0 %v1981_v14 }
 0xb97   :  { %1873 = vmatmul.mubr.msk.bf16.vlgmr.msra.gmra.mxu0 %vm282_vm2, %v1221_v27  ;;  %v1935_v27 = vld [vmem:[%s2439_s12 + $0x8] sm:$0xff]  }
 0xb98   :  { %1884 = vmatprep.mubr.msk.bf16.mxu0 %vm1982_vm1, %v1981_v14  ;;  %1883 = vmatpush3.bf16.msra.mxu0 %v1326_v31 }
 0xb99   :  { %1896 = vmatprep.subr.bf16.mxu0 %v1981_v14 }
 0xb9c   :  { %v1972_v28 = vpop.eup %1971 }
 0xb9d   :  { %v1220_v52 = vmul.f32 %v1972_v28, %v1968_v63  ;;  %v1936_v28 = vld [vmem:[%s2439_s12] sm:$0xff]  }
 0xb9f   :  { %v1222_v29 = vpack.c.bf16 %v1220_v52, %v1220_v52  ;;  %v1670_v52 = vld [vmem:[%s2440_s11] ss:$0 sm:$0xff] }
 0xba1   :  { %1879 = vmatmul.mubr.msk.bf16.vlgmr.msra.gmra.mxu1 %vm282_vm2, %v1222_v29 }
 0xba2   :  { %1892 = vmatprep.mubr.msk.bf16.mxu1 %vm1982_vm1, %v1981_v14 }
 0xc57   :  { %v1265_v32 = vpop.f32.mrf.mxu0 }
 0xc59   :  { %v1874_v33 = vpop.f32.mrf.mxu0 }
 0xc5b   :  { %v1268_v34 = vpop.f32.mrf.mxu0 }
 0xc5d   :  { %v1875_v51 = vpop.f32.mrf.mxu0 }
 0xc61   :  { %v1313_v35 = vpop.f32.mrf.mxu1 }
 0xc62   :  { %v1319_v36 = vpack.c.bf16 %v1313_v35, %v1265_v32 }
 0xc63   :  { %v1880_v37 = vpop.f32.mrf.mxu1 }
 0xc64   :  { %1885 = vmatmul.mubr.msk.bf16.vlgmr.msra.gmra.mxu0 %vm282_vm2, %v1319_v36 }
 0xc65   :  { %v1316_v38 = vpop.f32.mrf.mxu1  ;;  %1912 = vmatprep.mubr.msk.bf16.mxu0 %vm1982_vm1, %v1981_v14  ;;  %1897 = vmatpush3.bf16.msra.mxu0 %v1929_v22 }
 0xc66   :  { %1898 = vmatprep.subr.bf16.mxu0 %v1981_v14 }
 0xc67   :  { %v1881_v39 = vpop.f32.mrf.mxu1 }
 0xc69   :  { %1899 = vmatpush3.bf16.msra.mxu0 %v1930_v57 }
 0xc6a   :  { %1900 = vmatprep.subr.bf16.mxu0 %v1981_v14 }
 0xc6d   :  { %1901 = vmatpush3.bf16.msra.mxu0 %v1931_v23 }
 0xc6e   :  { %1902 = vmatprep.subr.bf16.mxu0 %v1981_v14 }
 0xc71   :  { %1903 = vmatpush3.bf16.msra.mxu0 %v1932_v24 }
 0xc72   :  { %1904 = vmatprep.subr.bf16.mxu0 %v1981_v14 }
 0xc75   :  { %1905 = vmatpush3.bf16.msra.mxu0 %v1933_v25 }
 0xc76   :  { %1906 = vmatprep.subr.bf16.mxu0 %v1981_v14 }
 0xc79   :  { %1907 = vmatpush3.bf16.msra.mxu0 %v1934_v26 }
 0xc7a   :  { %1908 = vmatprep.subr.bf16.mxu0 %v1981_v14 }
 0xc7d   :  { %1909 = vmatpush3.bf16.msra.mxu0 %v1935_v27 }
 0xc7e   :  { %1910 = vmatprep.subr.bf16.mxu0 %v1981_v14 }
 0xc81   :  { %1911 = vmatpush3.bf16.msra.mxu0 %v1936_v28 }
 0xd24   :  { %v1362_v40 = vpop.f32.mrf.mxu0 }
 0xd25   :  { %v1369_v42 = vadd.f32 %v1362_v40, %v1095_v9  ;;  %v1927_v9 = vld [vmem:[%s2436_s10 + $0x8] sm:$0xff]  }
 0xd26   :  { %v1886_v44 = vpop.f32.mrf.mxu0  ;;  %1889 = vmatpush3.bf16.msra.mxu1 %v1927_v9 }
 0xd27   :  { %v1378_v45 = vadd.f32 %v1667_v41, %v1369_v42  ;;  %1890 = vmatprep.subr.bf16.mxu1 %v1981_v14 }
 0xd28   :  { %v1365_v46 = vpop.f32.mrf.mxu0 }
 0xd29   :  { %v2353_v49 = vadd.f32 %v1378_v45, %v2064_v0  ;;  %v1370_v50 = vadd.f32 %v1365_v46, %v2321_v11 }
 0xd2a   :  { %v1887_v54 = vpop.f32.mrf.mxu0  ;;  %1891 = vmatpush3.bf16.msra.mxu1 %v1928_v47 }
 0xd2b   :  { %v1379_v55 = vadd.f32 %v1667_v41, %v1370_v50  ;;  %v1384_v58 = vsel %vm52_vm0, %v2353_v49, 0.0 }
 0xd2c   :  { %1385 = vadd.xlane.f32.xlu1 %v1384_v58 }
 0xd2d   :  { %v2359_v59 = vadd.f32 %v1379_v55, %v2069_v1 }
 0xd2f   :  { %v1387_v60 = vsel %vm52_vm0, %v2359_v59, 0.0 }
 0xd30   :  { %1388 = vadd.xlane.f32.xlu0 %v1387_v60 }
 0xdb5   :  { %v1386_v61 = vpop.xlane.xlu1 %1385 }
 0xdb6   :  { %v1390_v62 = vmul.f32 0.03125, %v1386_v61 }
 0xdb8   :  { %v1392_v0 = vsub.f32 %v2353_v49, %v1390_v62  ;;  %v1674_v62 = vld [vmem:[%s2441_s13] ss:$0 sm:$0xff] }
 0xdb9   :  { %v1389_v2 = vpop.xlane.xlu0 %1388 }
 0xdba   :  { %v1391_v3 = vmul.f32 0.03125, %v1389_v2  ;;  %v1394_v4 = vmul.f32 %v1392_v0, %v1392_v0 }
 0xdbc   :  { %v1393_v5 = vsub.f32 %v2359_v59, %v1391_v3  ;;  %v1396_v6 = vsel %vm52_vm0, %v1394_v4, 0.0 }
 0xdbd   :  { %1397 = vadd.xlane.f32.xlu0 %v1396_v6 }
 0xdbe   :  { %v1395_v8 = vmul.f32 %v1393_v5, %v1393_v5 }
 0xdc0   :  { %v1399_v1 = vsel %vm52_vm0, %v1395_v8, 0.0 }
 0xdc1   :  { %1400 = vadd.xlane.f32.xlu1 %v1399_v1 }
 0xe46   :  { %v1398_v56 = vpop.xlane.xlu0 %1397 }
 0xe47   :  { %v1402_v10 = vmul.f32 0.03125, %v1398_v56 }
 0xe49   :  { %v1404_v11 = vadd.f32 1e-05, %v1402_v10 }
 0xe4a   :  { %v1401_v12 = vpop.xlane.xlu1 %1400 }
 0xe4b   :  { %1973 = vrsqrt.f32 %v1404_v11  ;;  %v1403_v13 = vmul.f32 0.03125, %v1401_v12 }
 0xe4d   :  { %v1405_v15 = vadd.f32 1e-05, %v1403_v13 }
 0xe4f   :  { %1975 = vrsqrt.f32 %v1405_v15 }
 0xe58   :  { %v1974_v16 = vpop.eup %1973 }
 0xe59   :  { %v1408_v17 = vmul.f32 %v1974_v16, %v1392_v0 }
 0xe5b   :  { %v1416_v19 = vmul.f32 %v1668_v18, %v1408_v17 }
 0xe5c   :  { %v1976_v48 = vpop.eup %1975 }
 0xe5d   :  { %v1409_v7 = vmul.f32 %v1976_v48, %v1393_v5  ;;  %v1424_v20 = vadd.f32 %v1669_v53, %v1416_v19 }
 0xe5f   :  { %v1417_v43 = vmul.f32 %v1668_v18, %v1409_v7 }
 0xe61   :  { %v1425_v63 = vadd.f32 %v1669_v53, %v1417_v43 }
 0xe63   :  { %v1426_v21 = vpack.c.bf16 %v1425_v63, %v1424_v20 }
 0xe65   :  { %1893 = vmatmul.mubr.msk.bf16.vlgmr.msra.gmra.mxu1 %vm52_vm0, %v1426_v21 }
 0xf25   :  { %v1487_v29 = vpop.f32.mrf.mxu1 }
 0xf26   :  { %v1488_v30 = vadd.f32 %v1670_v52, %v1487_v29 }
 0xf27   :  { %v1894_v31 = vpop.f32.mrf.mxu1 }
 0xf28   :  { %v1496_v32 = vmul.f32 0.044715, %v1488_v30  ;;  %v1494_v50 = vmul.f32 0.5, %v1488_v30 }
 0xf29   :  { %v1490_v33 = vpop.f32.mrf.mxu1 }
 0xf2a   :  { %v1498_v34 = vmul.f32 %v1496_v32, %v1488_v30  ;;  %v1491_v51 = vadd.f32 %v1670_v52, %v1490_v33 }
 0xf2b   :  { %v1895_v35 = vpop.f32.mrf.mxu1 }
 0xf2c   :  { %v1500_v36 = vmul.f32 %v1498_v34, %v1488_v30  ;;  %v1497_v37 = vmul.f32 0.044715, %v1491_v51  ;;  %v1495_v54 = vmul.f32 0.5, %v1491_v51 }
 0xf2e   :  { %v1502_v38 = vadd.f32 %v1500_v36, %v1488_v30  ;;  %v1499_v39 = vmul.f32 %v1497_v37, %v1491_v51 }
 0xf30   :  { %v1504_v40 = vmul.f32 0.7978846, %v1502_v38  ;;  %v1501_v41 = vmul.f32 %v1499_v39, %v1491_v51 }
 0xf32   :  { %1977 = vtanh.f32 %v1504_v40  ;;  %v1503_v14 = vadd.f32 %v1501_v41, %v1491_v51 }
 0xf34   :  { %v1505_v42 = vmul.f32 0.7978846, %v1503_v14 }
 0xf36   :  { %1979 = vtanh.f32 %v1505_v42 }
 0xf3f   :  { %v1978_v44 = vpop.eup %1977 }
 0xf40   :  { %v1508_v45 = vadd.f32 1.0, %v1978_v44 }
 0xf42   :  { %v1510_v58 = vmul.f32 %v1508_v45, %v1494_v50 }
 0xf43   :  { %v1980_v46 = vpop.eup %1979 }
 0xf44   :  { %v1509_v55 = vadd.f32 1.0, %v1980_v46 }
 0xf46   :  { %v1511_v60 = vmul.f32 %v1509_v55, %v1495_v54 }
 0xf48   :  { %v1512_v61 = vpack.c.bf16 %v1511_v60, %v1510_v58 }
 0xf4a   :  { %1913 = vmatmul.mubr.bf16.vlgmr.msra.gmra.mxu0 %v1512_v61 }
0x100a   :  { %v1618_v0 = vpop.f32.mrf.mxu0 }
0x100b   :  { %v1619_v2 = vadd.f32 %v1674_v62, %v1618_v0 }
0x100c   :  { %v1914_v3 = vpop.f32.mrf.mxu0 }
0x100d   :  { %v1625_v4 = vadd.f32 %v1619_v2, %v2353_v49 }
0x100e   :  { %v1621_v5 = vpop.f32.mrf.mxu0 }
0x100f   :  { %1627 = vst.msk [vmem:[%s2442_s14] sm:$0xff] %vm52_vm0, %v1625_v4  ;;  %v1622_v6 = vadd.f32 %v1674_v62, %v1621_v5 }
0x1010   :  { %v1915_v8 = vpop.f32.mrf.mxu0 }
0x1011   :  { %v1626_v1 = vadd.f32 %v1622_v6, %v2359_v59 }
0x1013   :  { %1628 = vst.msk [vmem:[%s2442_s14 + $0x8] sm:$0xff] %vm52_vm0, %v1626_v1 }

</bundles_post_ra>
